<compile_context>
chip_gen: v5e
topology: v5e:2x2
jax: 0.10.0
libtpu: 0.0.40
codegen_flags: <defaults>
</compile_context>

<pallas_src>
import math
import functools

import numpy as np
import jax
import jax.numpy as jnp
from jax import lax
from jax.experimental import pallas as pl
from jax.experimental.pallas import tpu as pltpu

PARAM_ORDER = [
    "wqkv", "bqkv", "wout", "bout",
    "g1", "b1", "wf1", "bf1", "wf2", "bf2", "g2", "b2",
    "wc3", "bc", "gc", "bcn",
]


def _layer_norm(y, gamma, beta, eps=1e-5):
    mu = jnp.mean(y, axis=-1, keepdims=True)
    var = jnp.mean((y - mu) ** 2, axis=-1, keepdims=True)
    return (y - mu) * lax.rsqrt(var + eps) * gamma + beta


def informer_encoder_kernel(
    x_ref, wqkv_ref, bqkv_ref, wout_ref, bout_ref,
    g1_ref, b1_ref, wf1_ref, bf1_ref, wf2_ref, bf2_ref, g2_ref, b2_ref,
    wc3_ref, bc_ref, gc_ref, bcn_ref,
    o_ref, *, n_heads, n_top, n_out, eps):
    f32 = jnp.float32
    x = x_ref[0].astype(f32)                                  # (N, C)
    N, C = x.shape
    dk = C // n_heads
    scale = 1.0 / math.sqrt(dk)

    # ---------------- ProbSparse self-attention ----------------
    # Fused QKV projection: single wide MXU matmul (K = C), native MXU precision.
    qkv = jnp.dot(x, wqkv_ref[...], preferred_element_type=f32) + bqkv_ref[...]   # (N, 3C)
    # fold the attention scale into Q once (cheaper than scaling every (N,N) score matrix)
    q_all = qkv[:, :C] * f32(scale)                                               # (N, C)

    # identity matrix for an exact (MXU) transpose of the per-head M-score column vector
    ri = lax.broadcasted_iota(jnp.int32, (N, N), 0)
    ci = lax.broadcasted_iota(jnp.int32, (N, N), 1)
    eye = (ri == ci).astype(f32)

    head_outs = []
    for h in range(n_heads):
        qh = q_all[:, h * dk:(h + 1) * dk]                     # (N, dk), pre-scaled
        kh = qkv[:, C + h * dk:C + (h + 1) * dk]               # (N, dk)
        vh = qkv[:, 2 * C + h * dk:2 * C + (h + 1) * dk]       # (N, dk)

        # scores: HIGHEST precision so the discrete top-k selection below is stable
        s = lax.dot_general(qh, kh, (((1,), (1,)), ((), ())),
                            precision=lax.Precision.HIGHEST,
                            preferred_element_type=f32)                  # (N, N)

        # ProbSparse M score per query row; row_max is reused for the softmax shift below.
        row_max = jnp.max(s, axis=-1, keepdims=True)                      # (N, 1)
        m = row_max - jnp.mean(s, axis=-1, keepdims=True)                 # (N, 1)
        # exact transpose (1, N) of m via identity matmul (bit-identical values)
        m_t = lax.dot_general(m, eye, (((0,), (0,)), ((), ())),
                              precision=lax.Precision.HIGHEST,
                              preferred_element_type=f32)                 # (1, N)
        # rank_i = #{ j : m_j > m_i };  selected iff rank < n_top  (== m_i >= n_top-th largest)
        rank = jnp.sum((m_t > m).astype(f32), axis=-1, keepdims=True)     # (N, 1)
        selected = rank < (n_top - 0.5)                                   # (N, 1) bool

        # Selected rows: regular softmax(s).  Non-selected rows (fully masked with -1e9 in the
        # reference) reduce to the uniform 1/N distribution == exp(0) rows normalized.
        p = jnp.exp(jnp.where(selected, s - row_max, f32(0.0)))           # (N, N)
        p = p * pl.reciprocal(jnp.sum(p, axis=-1, keepdims=True), approx=True)
        head_outs.append(jnp.dot(p, vh, preferred_element_type=f32))      # (N, dk)

    o_cat = jnp.concatenate(head_outs, axis=-1)                           # (N, C)
    attn_out = jnp.dot(o_cat, wout_ref[...], preferred_element_type=f32) + bout_ref[...]

    # ---------------- residual + norm1 ----------------
    y = _layer_norm(x + attn_out, g1_ref[...], b1_ref[...], eps)

    # ---------------- FFN (Linear -> exact GELU -> Linear) + residual + norm2 ----------------
    h1 = jnp.dot(y, wf1_ref[...], preferred_element_type=f32) + bf1_ref[...]
    h1 = 0.5 * h1 * (1.0 + lax.erf(h1 * f32(1.0 / math.sqrt(2.0))))
    h2 = jnp.dot(h1, wf2_ref[...], preferred_element_type=f32) + bf2_ref[...]
    z = _layer_norm(y + h2, g2_ref[...], b2_ref[...], eps)                # (N, C)

    # ---------------- distilling ConvLayer ----------------
    # circular Conv1d(k=3, pad=1): fused into one (N, 3C) @ (3C, C) matmul.
    zm1 = jnp.concatenate([z[N - 1:N, :], z[:N - 1, :]], axis=0)          # z[(n-1) % N]
    zp1 = jnp.concatenate([z[1:, :], z[0:1, :]], axis=0)                  # z[(n+1) % N]
    x3 = jnp.concatenate([zm1, z, zp1], axis=-1)                          # (N, 3C)
    conv = jnp.dot(x3, wc3_ref[...], preferred_element_type=f32) + bc_ref[...]   # (N, C)

    # MaxPool1d(kernel=3, stride=2, padding=1):
    #   m3[n] = max(conv[n-1], conv[n], conv[n+1]) with -inf boundary padding,
    #   pooled[j] = m3[2j]  -> stride-2 row gather as an exact one-hot matmul.
    neg = jnp.full((1, C), -1e30, f32)
    prev = jnp.concatenate([neg, conv[:N - 1, :]], axis=0)
    nxt = jnp.concatenate([conv[1:, :], neg], axis=0)
    m3 = jnp.maximum(jnp.maximum(prev, conv), nxt)                        # (N, C)
    pr = lax.broadcasted_iota(jnp.int32, (n_out, N), 0)
    pc = lax.broadcasted_iota(jnp.int32, (n_out, N), 1)
    sel_pool = (pc == 2 * pr).astype(f32)                                 # (n_out, N)
    pooled = jnp.dot(sel_pool, m3, precision=lax.Precision.HIGHEST,
                     preferred_element_type=f32)                          # (n_out, C)

    # ELU then LayerNorm
    act = jnp.where(pooled > 0, pooled, jnp.exp(jnp.minimum(pooled, 0.0)) - 1.0)
    out = _layer_norm(act, gc_ref[...], bcn_ref[...], eps)
    o_ref[0] = out.astype(o_ref.dtype)


def informer_encoder_layer(x, params, n_heads):
    B, N, C = x.shape
    Dff = params["wf1"].shape[1]
    n_top = max(1, min(int(N * 0.25), N - 1))
    n_out = (N - 1) // 2 + 1
    dk = C // n_heads

    kernel = functools.partial(informer_encoder_kernel, n_heads=n_heads,
                               n_top=n_top, n_out=n_out, eps=1e-5)
    param_list = [params[k] for k in PARAM_ORDER]

    def full_spec(a):
        r = a.ndim
        return pl.BlockSpec(a.shape, lambda b, _r=r: (0,) * _r)

    in_specs = ([pl.BlockSpec((1, N, C), lambda b: (b, 0, 0))]
                + [full_spec(a) for a in param_list])
    out_spec = pl.BlockSpec((1, n_out, C), lambda b: (b, 0, 0))

    # advisory cost estimate for the XLA scheduler
    flops = int(B * (
        2 * N * C * 3 * C                        # fused QKV projection
        + n_heads * (4 * N * N * dk + 2 * N * N)  # QK^T + PV + rank/transpose helpers
        + 2 * N * C * C                          # output projection
        + 4 * N * C * Dff                        # FFN
        + 2 * N * 3 * C * C                      # fused circular conv
        + 2 * n_out * N * C                      # stride-2 pooling gather
    ))
    transcendentals = int(B * (n_heads * N * N + N * Dff + n_out * C + 8 * N))
    param_elems = sum(int(np.prod(a.shape)) for a in param_list)
    bytes_accessed = int(4 * (B * N * C + B * n_out * C + B * param_elems))
    cost = pl.CostEstimate(flops=flops, transcendentals=transcendentals,
                           bytes_accessed=bytes_accessed)

    return pl.pallas_call(
        kernel,
        out_shape=jax.ShapeDtypeStruct((B, n_out, C), x.dtype),
        grid_spec=pltpu.PrefetchScalarGridSpec(
            num_scalar_prefetch=0, grid=(B,),
            in_specs=in_specs, out_specs=out_spec),
        compiler_params=pltpu.CompilerParams(
            dimension_semantics=("parallel",),
            vmem_limit_bytes=32 * 1024 * 1024),
        cost_estimate=cost,
    )(x, *param_list)


# ---------------- pure-JAX reference (for correctness check) ----------------
def reference(x, p, n_heads):
    B, N, C = x.shape
    dk = C // n_heads
    scale = 1.0 / math.sqrt(dk)
    n_top = max(1, min(int(N * 0.25), N - 1))

    qkv = x @ p["wqkv"] + p["bqkv"]                                        # (B, N, 3C)
    qkv = qkv.reshape(B, N, 3, n_heads, dk).transpose(2, 0, 3, 1, 4)       # (3, B, H, N, dk)
    q, k, v = qkv[0], qkv[1], qkv[2]
    attn = jnp.einsum("bhnd,bhmd->bhnm", q, k,
                      precision=lax.Precision.HIGHEST) * scale
    M = jnp.max(attn, -1) - jnp.mean(attn, -1)                             # (B, H, N)
    thr = lax.top_k(M, n_top)[0][..., -1:]
    sel = M >= thr
    attn = jnp.where(sel[..., None], attn, jnp.float32(-1e9))
    pa = jax.nn.softmax(attn, axis=-1)
    o = jnp.einsum("bhnm,bhmd->bhnd", pa, v)
    o = o.transpose(0, 2, 1, 3).reshape(B, N, C)
    attn_out = o @ p["wout"] + p["bout"]

    y = _layer_norm(x + attn_out, p["g1"], p["b1"])
    h1 = y @ p["wf1"] + p["bf1"]
    h1 = 0.5 * h1 * (1.0 + lax.erf(h1 * jnp.float32(1.0 / math.sqrt(2.0))))
    h2 = h1 @ p["wf2"] + p["bf2"]
    z = _layer_norm(y + h2, p["g2"], p["b2"])

    zm1 = jnp.roll(z, 1, axis=1)
    zp1 = jnp.roll(z, -1, axis=1)
    x3 = jnp.concatenate([zm1, z, zp1], axis=-1)
    conv = x3 @ p["wc3"] + p["bc"]

    n_out = (N - 1) // 2 + 1
    padded = jnp.pad(conv, ((0, 0), (1, 1), (0, 0)), constant_values=-1e30)
    pooled = jnp.stack([jnp.max(padded[:, 2 * j:2 * j + 3], axis=1) for j in range(n_out)], axis=1)
    act = jnp.where(pooled > 0, pooled, jnp.exp(jnp.minimum(pooled, 0.0)) - 1.0)
    return _layer_norm(act, p["gc"], p["bcn"])


if __name__ == "__main__":
    B, N, C, H, Dff = 2, 8, 32, 4, 64

    key = jax.random.PRNGKey(0)
    ks = jax.random.split(key, 17)

    def nrm(k, shape, s=0.05):
        return (s * jax.random.normal(k, shape)).astype(jnp.float32)

    params = {
        "wqkv": nrm(ks[0], (C, 3 * C)), "bqkv": nrm(ks[1], (1, 3 * C)),
        "wout": nrm(ks[2], (C, C)), "bout": nrm(ks[3], (1, C)),
        "g1": (1.0 + 0.05 * jax.random.normal(ks[4], (1, C))).astype(jnp.float32),
        "b1": nrm(ks[5], (1, C)),
        "wf1": nrm(ks[6], (C, Dff)), "bf1": nrm(ks[7], (1, Dff)),
        "wf2": nrm(ks[8], (Dff, C)), "bf2": nrm(ks[9], (1, C)),
        "g2": (1.0 + 0.05 * jax.random.normal(ks[10], (1, C))).astype(jnp.float32),
        "b2": nrm(ks[11], (1, C)),
        "wc3": nrm(ks[12], (3 * C, C)), "bc": nrm(ks[13], (1, C)),
        "gc": (1.0 + 0.05 * jax.random.normal(ks[14], (1, C))).astype(jnp.float32),
        "bcn": nrm(ks[15], (1, C)),
    }
    x = jax.random.normal(ks[16], (B, N, C), dtype=jnp.float32)

    out = informer_encoder_layer(x, params, H)
    out = jax.block_until_ready(out)

    ref = reference(x, params, H)
    assert out.shape == (B, (N - 1) // 2 + 1, C), out.shape
    np.testing.assert_allclose(np.asarray(out), np.asarray(ref), rtol=2e-2, atol=2e-2)
    print("KERNEL_OK")
</pallas_src>

<mosaic_0001>
module attributes {stable_mosaic.version = 11 : i64} {
  func.func @informer_encoder_kernel(%arg0: i32, %arg1: memref<1x8x32xf32, #tpu.memory_space<vmem>>, %arg2: memref<32x96xf32, #tpu.memory_space<vmem>>, %arg3: memref<1x96xf32, #tpu.memory_space<vmem>>, %arg4: memref<32x32xf32, #tpu.memory_space<vmem>>, %arg5: memref<1x32xf32, #tpu.memory_space<vmem>>, %arg6: memref<1x32xf32, #tpu.memory_space<vmem>>, %arg7: memref<1x32xf32, #tpu.memory_space<vmem>>, %arg8: memref<32x64xf32, #tpu.memory_space<vmem>>, %arg9: memref<1x64xf32, #tpu.memory_space<vmem>>, %arg10: memref<64x32xf32, #tpu.memory_space<vmem>>, %arg11: memref<1x32xf32, #tpu.memory_space<vmem>>, %arg12: memref<1x32xf32, #tpu.memory_space<vmem>>, %arg13: memref<1x32xf32, #tpu.memory_space<vmem>>, %arg14: memref<96x32xf32, #tpu.memory_space<vmem>>, %arg15: memref<1x32xf32, #tpu.memory_space<vmem>>, %arg16: memref<1x32xf32, #tpu.memory_space<vmem>>, %arg17: memref<1x32xf32, #tpu.memory_space<vmem>>, %arg18: memref<1x4x32xf32, #tpu.memory_space<vmem>>) attributes {dimension_semantics = [#tpu.dimension_semantics<parallel>], iteration_bounds = array<i64: 2>, scalar_prefetch = 0 : i64, scratch_operands = 0 : i64, tpu.core_type = #tpu.core_type<tc>, window_params = [{transform_indices = @transform_0, window_bounds = array<i64: 1, 8, 32>}, {pipeline_mode = #tpu.pipeline_mode<synchronous>, transform_indices = @transform_1, window_bounds = array<i64: 32, 96>}, {pipeline_mode = #tpu.pipeline_mode<synchronous>, transform_indices = @transform_2, window_bounds = array<i64: 1, 96>}, {pipeline_mode = #tpu.pipeline_mode<synchronous>, transform_indices = @transform_3, window_bounds = array<i64: 32, 32>}, {pipeline_mode = #tpu.pipeline_mode<synchronous>, transform_indices = @transform_4, window_bounds = array<i64: 1, 32>}, {pipeline_mode = #tpu.pipeline_mode<synchronous>, transform_indices = @transform_5, window_bounds = array<i64: 1, 32>}, {pipeline_mode = #tpu.pipeline_mode<synchronous>, transform_indices = @transform_6, window_bounds = array<i64: 1, 32>}, {pipeline_mode = #tpu.pipeline_mode<synchronous>, transform_indices = @transform_7, window_bounds = array<i64: 32, 64>}, {pipeline_mode = #tpu.pipeline_mode<synchronous>, transform_indices = @transform_8, window_bounds = array<i64: 1, 64>}, {pipeline_mode = #tpu.pipeline_mode<synchronous>, transform_indices = @transform_9, window_bounds = array<i64: 64, 32>}, {pipeline_mode = #tpu.pipeline_mode<synchronous>, transform_indices = @transform_10, window_bounds = array<i64: 1, 32>}, {pipeline_mode = #tpu.pipeline_mode<synchronous>, transform_indices = @transform_11, window_bounds = array<i64: 1, 32>}, {pipeline_mode = #tpu.pipeline_mode<synchronous>, transform_indices = @transform_12, window_bounds = array<i64: 1, 32>}, {pipeline_mode = #tpu.pipeline_mode<synchronous>, transform_indices = @transform_13, window_bounds = array<i64: 96, 32>}, {pipeline_mode = #tpu.pipeline_mode<synchronous>, transform_indices = @transform_14, window_bounds = array<i64: 1, 32>}, {pipeline_mode = #tpu.pipeline_mode<synchronous>, transform_indices = @transform_15, window_bounds = array<i64: 1, 32>}, {pipeline_mode = #tpu.pipeline_mode<synchronous>, transform_indices = @transform_16, window_bounds = array<i64: 1, 32>}, {transform_indices = @transform_17, window_bounds = array<i64: 1, 4, 32>}]} {
    %c0 = arith.constant 0 : index
    %c0_0 = arith.constant 0 : index
    %c0_1 = arith.constant 0 : index
    %0 = vector.load %arg1[%c0, %c0_0, %c0_1] : memref<1x8x32xf32, #tpu.memory_space<vmem>>, vector<1x8x32xf32>
    %1 = vector.shape_cast %0 : vector<1x8x32xf32> to vector<8x32xf32>
    %c0_2 = arith.constant 0 : index
    %c0_3 = arith.constant 0 : index
    %2 = vector.load %arg2[%c0_2, %c0_3] : memref<32x96xf32, #tpu.memory_space<vmem>>, vector<32x96xf32>
    %cst = arith.constant dense<0.000000e+00> : vector<8x96xf32>
    %3 = tpu.matmul %1, %2, %cst {dimension_numbers = #tpu.dot_dimension_numbers<[1], [0], [0], [1], [0, 0, 1, 1], [], []>} : vector<8x32xf32>, vector<32x96xf32>, vector<8x96xf32> -> vector<8x96xf32>
    %c0_4 = arith.constant 0 : index
    %c0_5 = arith.constant 0 : index
    %4 = vector.load %arg3[%c0_4, %c0_5] : memref<1x96xf32, #tpu.memory_space<vmem>>, vector<1x96xf32>
    %5 = vector.broadcast %4 : vector<1x96xf32> to vector<8x96xf32>
    %6 = arith.addf %3, %5 : vector<8x96xf32>
    %7 = vector.extract_strided_slice %6 {offsets = [0, 0], sizes = [8, 32], strides = [1, 1]} : vector<8x96xf32> to vector<8x32xf32>
    %cst_6 = arith.constant 0.353553385 : f32
    %8 = vector.broadcast %cst_6 : f32 to vector<8x32xf32>
    %9 = arith.mulf %7, %8 : vector<8x32xf32>
    %10 = tpu.iota {dimensions = array<i32: 0>} : vector<8x8xi32>
    %11 = tpu.iota {dimensions = array<i32: 1>} : vector<8x8xi32>
    %12 = arith.cmpi eq, %10, %11 : vector<8x8xi32>
    %13 = arith.extui %12 : vector<8x8xi1> to vector<8x8xi32>
    %14 = arith.sitofp %13 : vector<8x8xi32> to vector<8x8xf32>
    %15 = vector.extract_strided_slice %9 {offsets = [0, 0], sizes = [8, 8], strides = [1, 1]} : vector<8x32xf32> to vector<8x8xf32>
    %16 = vector.extract_strided_slice %6 {offsets = [0, 32], sizes = [8, 8], strides = [1, 1]} : vector<8x96xf32> to vector<8x8xf32>
    %17 = vector.extract_strided_slice %6 {offsets = [0, 64], sizes = [8, 8], strides = [1, 1]} : vector<8x96xf32> to vector<8x8xf32>
    %cst_7 = arith.constant dense<0.000000e+00> : vector<8x8xf32>
    %18 = tpu.matmul %15, %16, %cst_7 {dimension_numbers = #tpu.dot_dimension_numbers<[1], [1], [0], [0], [0, 0, 1, 0], [], []>, precision = #tpu.contract_precision<fp32>} : vector<8x8xf32>, vector<8x8xf32>, vector<8x8xf32> -> vector<8x8xf32>
    %cst_8 = arith.constant dense<0xFF800000> : vector<8xf32>
    %19 = vector.multi_reduction <maximumf>, %18, %cst_8 [1] : vector<8x8xf32> to vector<8xf32>
    %20 = vector.shape_cast %19 : vector<8xf32> to vector<8x1xf32>
    %cst_9 = arith.constant dense<0.000000e+00> : vector<8xf32>
    %21 = vector.multi_reduction <add>, %18, %cst_9 [1] : vector<8x8xf32> to vector<8xf32>
    %22 = vector.shape_cast %21 : vector<8xf32> to vector<8x1xf32>
    %cst_10 = arith.constant 8.000000e+00 : f32
    %23 = vector.broadcast %cst_10 : f32 to vector<8x1xf32>
    %24 = arith.divf %22, %23 : vector<8x1xf32>
    %25 = arith.subf %20, %24 : vector<8x1xf32>
    %cst_11 = arith.constant dense<0.000000e+00> : vector<1x8xf32>
    %26 = tpu.matmul %25, %14, %cst_11 {dimension_numbers = #tpu.dot_dimension_numbers<[0], [0], [1], [1], [0, 1, 1, 1], [], []>, precision = #tpu.contract_precision<fp32>} : vector<8x1xf32>, vector<8x8xf32>, vector<1x8xf32> -> vector<1x8xf32>
    %27 = vector.broadcast %26 : vector<1x8xf32> to vector<8x8xf32>
    %28 = vector.broadcast %25 : vector<8x1xf32> to vector<8x8xf32>
    %29 = arith.cmpf ogt, %27, %28 : vector<8x8xf32>
    %30 = arith.extui %29 : vector<8x8xi1> to vector<8x8xi32>
    %31 = arith.sitofp %30 : vector<8x8xi32> to vector<8x8xf32>
    %cst_12 = arith.constant dense<0.000000e+00> : vector<8xf32>
    %32 = vector.multi_reduction <add>, %31, %cst_12 [1] : vector<8x8xf32> to vector<8xf32>
    %33 = vector.shape_cast %32 : vector<8xf32> to vector<8x1xf32>
    %cst_13 = arith.constant 1.500000e+00 : f32
    %34 = vector.broadcast %cst_13 : f32 to vector<8x1xf32>
    %35 = arith.cmpf olt, %33, %34 : vector<8x1xf32>
    %36 = vector.broadcast %20 : vector<8x1xf32> to vector<8x8xf32>
    %37 = arith.subf %18, %36 : vector<8x8xf32>
    %cst_14 = arith.constant 0.000000e+00 : f32
    %38 = vector.shape_cast %35 : vector<8x1xi1> to vector<8x1xi1>
    %39 = vector.broadcast %38 : vector<8x1xi1> to vector<8x8xi1>
    %40 = vector.broadcast %cst_14 : f32 to vector<8x8xf32>
    %41 = arith.select %39, %37, %40 : vector<8x8xi1>, vector<8x8xf32>
    %42 = math.exp %41 : vector<8x8xf32>
    %cst_15 = arith.constant dense<0.000000e+00> : vector<8xf32>
    %43 = vector.multi_reduction <add>, %42, %cst_15 [1] : vector<8x8xf32> to vector<8xf32>
    %44 = vector.shape_cast %43 : vector<8xf32> to vector<8x1xf32>
    %45 = tpu.reciprocal %44 {approx = true} : vector<8x1xf32> -> vector<8x1xf32>
    %46 = vector.broadcast %45 : vector<8x1xf32> to vector<8x8xf32>
    %47 = arith.mulf %42, %46 : vector<8x8xf32>
    %cst_16 = arith.constant dense<0.000000e+00> : vector<8x8xf32>
    %48 = tpu.matmul %47, %17, %cst_16 {dimension_numbers = #tpu.dot_dimension_numbers<[1], [0], [0], [1], [0, 0, 1, 1], [], []>} : vector<8x8xf32>, vector<8x8xf32>, vector<8x8xf32> -> vector<8x8xf32>
    %49 = vector.extract_strided_slice %9 {offsets = [0, 8], sizes = [8, 8], strides = [1, 1]} : vector<8x32xf32> to vector<8x8xf32>
    %50 = vector.extract_strided_slice %6 {offsets = [0, 40], sizes = [8, 8], strides = [1, 1]} : vector<8x96xf32> to vector<8x8xf32>
    %51 = vector.extract_strided_slice %6 {offsets = [0, 72], sizes = [8, 8], strides = [1, 1]} : vector<8x96xf32> to vector<8x8xf32>
    %cst_17 = arith.constant dense<0.000000e+00> : vector<8x8xf32>
    %52 = tpu.matmul %49, %50, %cst_17 {dimension_numbers = #tpu.dot_dimension_numbers<[1], [1], [0], [0], [0, 0, 1, 0], [], []>, precision = #tpu.contract_precision<fp32>} : vector<8x8xf32>, vector<8x8xf32>, vector<8x8xf32> -> vector<8x8xf32>
    %cst_18 = arith.constant dense<0xFF800000> : vector<8xf32>
    %53 = vector.multi_reduction <maximumf>, %52, %cst_18 [1] : vector<8x8xf32> to vector<8xf32>
    %54 = vector.shape_cast %53 : vector<8xf32> to vector<8x1xf32>
    %cst_19 = arith.constant dense<0.000000e+00> : vector<8xf32>
    %55 = vector.multi_reduction <add>, %52, %cst_19 [1] : vector<8x8xf32> to vector<8xf32>
    %56 = vector.shape_cast %55 : vector<8xf32> to vector<8x1xf32>
    %cst_20 = arith.constant 8.000000e+00 : f32
    %57 = vector.broadcast %cst_20 : f32 to vector<8x1xf32>
    %58 = arith.divf %56, %57 : vector<8x1xf32>
    %59 = arith.subf %54, %58 : vector<8x1xf32>
    %cst_21 = arith.constant dense<0.000000e+00> : vector<1x8xf32>
    %60 = tpu.matmul %59, %14, %cst_21 {dimension_numbers = #tpu.dot_dimension_numbers<[0], [0], [1], [1], [0, 1, 1, 1], [], []>, precision = #tpu.contract_precision<fp32>} : vector<8x1xf32>, vector<8x8xf32>, vector<1x8xf32> -> vector<1x8xf32>
    %61 = vector.broadcast %60 : vector<1x8xf32> to vector<8x8xf32>
    %62 = vector.broadcast %59 : vector<8x1xf32> to vector<8x8xf32>
    %63 = arith.cmpf ogt, %61, %62 : vector<8x8xf32>
    %64 = arith.extui %63 : vector<8x8xi1> to vector<8x8xi32>
    %65 = arith.sitofp %64 : vector<8x8xi32> to vector<8x8xf32>
    %cst_22 = arith.constant dense<0.000000e+00> : vector<8xf32>
    %66 = vector.multi_reduction <add>, %65, %cst_22 [1] : vector<8x8xf32> to vector<8xf32>
    %67 = vector.shape_cast %66 : vector<8xf32> to vector<8x1xf32>
    %cst_23 = arith.constant 1.500000e+00 : f32
    %68 = vector.broadcast %cst_23 : f32 to vector<8x1xf32>
    %69 = arith.cmpf olt, %67, %68 : vector<8x1xf32>
    %70 = vector.broadcast %54 : vector<8x1xf32> to vector<8x8xf32>
    %71 = arith.subf %52, %70 : vector<8x8xf32>
    %cst_24 = arith.constant 0.000000e+00 : f32
    %72 = vector.shape_cast %69 : vector<8x1xi1> to vector<8x1xi1>
    %73 = vector.broadcast %72 : vector<8x1xi1> to vector<8x8xi1>
    %74 = vector.broadcast %cst_24 : f32 to vector<8x8xf32>
    %75 = arith.select %73, %71, %74 : vector<8x8xi1>, vector<8x8xf32>
    %76 = math.exp %75 : vector<8x8xf32>
    %cst_25 = arith.constant dense<0.000000e+00> : vector<8xf32>
    %77 = vector.multi_reduction <add>, %76, %cst_25 [1] : vector<8x8xf32> to vector<8xf32>
    %78 = vector.shape_cast %77 : vector<8xf32> to vector<8x1xf32>
    %79 = tpu.reciprocal %78 {approx = true} : vector<8x1xf32> -> vector<8x1xf32>
    %80 = vector.broadcast %79 : vector<8x1xf32> to vector<8x8xf32>
    %81 = arith.mulf %76, %80 : vector<8x8xf32>
    %cst_26 = arith.constant dense<0.000000e+00> : vector<8x8xf32>
    %82 = tpu.matmul %81, %51, %cst_26 {dimension_numbers = #tpu.dot_dimension_numbers<[1], [0], [0], [1], [0, 0, 1, 1], [], []>} : vector<8x8xf32>, vector<8x8xf32>, vector<8x8xf32> -> vector<8x8xf32>
    %83 = vector.extract_strided_slice %9 {offsets = [0, 16], sizes = [8, 8], strides = [1, 1]} : vector<8x32xf32> to vector<8x8xf32>
    %84 = vector.extract_strided_slice %6 {offsets = [0, 48], sizes = [8, 8], strides = [1, 1]} : vector<8x96xf32> to vector<8x8xf32>
    %85 = vector.extract_strided_slice %6 {offsets = [0, 80], sizes = [8, 8], strides = [1, 1]} : vector<8x96xf32> to vector<8x8xf32>
    %cst_27 = arith.constant dense<0.000000e+00> : vector<8x8xf32>
    %86 = tpu.matmul %83, %84, %cst_27 {dimension_numbers = #tpu.dot_dimension_numbers<[1], [1], [0], [0], [0, 0, 1, 0], [], []>, precision = #tpu.contract_precision<fp32>} : vector<8x8xf32>, vector<8x8xf32>, vector<8x8xf32> -> vector<8x8xf32>
    %cst_28 = arith.constant dense<0xFF800000> : vector<8xf32>
    %87 = vector.multi_reduction <maximumf>, %86, %cst_28 [1] : vector<8x8xf32> to vector<8xf32>
    %88 = vector.shape_cast %87 : vector<8xf32> to vector<8x1xf32>
    %cst_29 = arith.constant dense<0.000000e+00> : vector<8xf32>
    %89 = vector.multi_reduction <add>, %86, %cst_29 [1] : vector<8x8xf32> to vector<8xf32>
    %90 = vector.shape_cast %89 : vector<8xf32> to vector<8x1xf32>
    %cst_30 = arith.constant 8.000000e+00 : f32
    %91 = vector.broadcast %cst_30 : f32 to vector<8x1xf32>
    %92 = arith.divf %90, %91 : vector<8x1xf32>
    %93 = arith.subf %88, %92 : vector<8x1xf32>
    %cst_31 = arith.constant dense<0.000000e+00> : vector<1x8xf32>
    %94 = tpu.matmul %93, %14, %cst_31 {dimension_numbers = #tpu.dot_dimension_numbers<[0], [0], [1], [1], [0, 1, 1, 1], [], []>, precision = #tpu.contract_precision<fp32>} : vector<8x1xf32>, vector<8x8xf32>, vector<1x8xf32> -> vector<1x8xf32>
    %95 = vector.broadcast %94 : vector<1x8xf32> to vector<8x8xf32>
    %96 = vector.broadcast %93 : vector<8x1xf32> to vector<8x8xf32>
    %97 = arith.cmpf ogt, %95, %96 : vector<8x8xf32>
    %98 = arith.extui %97 : vector<8x8xi1> to vector<8x8xi32>
    %99 = arith.sitofp %98 : vector<8x8xi32> to vector<8x8xf32>
    %cst_32 = arith.constant dense<0.000000e+00> : vector<8xf32>
    %100 = vector.multi_reduction <add>, %99, %cst_32 [1] : vector<8x8xf32> to vector<8xf32>
    %101 = vector.shape_cast %100 : vector<8xf32> to vector<8x1xf32>
    %cst_33 = arith.constant 1.500000e+00 : f32
    %102 = vector.broadcast %cst_33 : f32 to vector<8x1xf32>
    %103 = arith.cmpf olt, %101, %102 : vector<8x1xf32>
    %104 = vector.broadcast %88 : vector<8x1xf32> to vector<8x8xf32>
    %105 = arith.subf %86, %104 : vector<8x8xf32>
    %cst_34 = arith.constant 0.000000e+00 : f32
    %106 = vector.shape_cast %103 : vector<8x1xi1> to vector<8x1xi1>
    %107 = vector.broadcast %106 : vector<8x1xi1> to vector<8x8xi1>
    %108 = vector.broadcast %cst_34 : f32 to vector<8x8xf32>
    %109 = arith.select %107, %105, %108 : vector<8x8xi1>, vector<8x8xf32>
    %110 = math.exp %109 : vector<8x8xf32>
    %cst_35 = arith.constant dense<0.000000e+00> : vector<8xf32>
    %111 = vector.multi_reduction <add>, %110, %cst_35 [1] : vector<8x8xf32> to vector<8xf32>
    %112 = vector.shape_cast %111 : vector<8xf32> to vector<8x1xf32>
    %113 = tpu.reciprocal %112 {approx = true} : vector<8x1xf32> -> vector<8x1xf32>
    %114 = vector.broadcast %113 : vector<8x1xf32> to vector<8x8xf32>
    %115 = arith.mulf %110, %114 : vector<8x8xf32>
    %cst_36 = arith.constant dense<0.000000e+00> : vector<8x8xf32>
    %116 = tpu.matmul %115, %85, %cst_36 {dimension_numbers = #tpu.dot_dimension_numbers<[1], [0], [0], [1], [0, 0, 1, 1], [], []>} : vector<8x8xf32>, vector<8x8xf32>, vector<8x8xf32> -> vector<8x8xf32>
    %117 = vector.extract_strided_slice %9 {offsets = [0, 24], sizes = [8, 8], strides = [1, 1]} : vector<8x32xf32> to vector<8x8xf32>
    %118 = vector.extract_strided_slice %6 {offsets = [0, 56], sizes = [8, 8], strides = [1, 1]} : vector<8x96xf32> to vector<8x8xf32>
    %119 = vector.extract_strided_slice %6 {offsets = [0, 88], sizes = [8, 8], strides = [1, 1]} : vector<8x96xf32> to vector<8x8xf32>
    %cst_37 = arith.constant dense<0.000000e+00> : vector<8x8xf32>
    %120 = tpu.matmul %117, %118, %cst_37 {dimension_numbers = #tpu.dot_dimension_numbers<[1], [1], [0], [0], [0, 0, 1, 0], [], []>, precision = #tpu.contract_precision<fp32>} : vector<8x8xf32>, vector<8x8xf32>, vector<8x8xf32> -> vector<8x8xf32>
    %cst_38 = arith.constant dense<0xFF800000> : vector<8xf32>
    %121 = vector.multi_reduction <maximumf>, %120, %cst_38 [1] : vector<8x8xf32> to vector<8xf32>
    %122 = vector.shape_cast %121 : vector<8xf32> to vector<8x1xf32>
    %cst_39 = arith.constant dense<0.000000e+00> : vector<8xf32>
    %123 = vector.multi_reduction <add>, %120, %cst_39 [1] : vector<8x8xf32> to vector<8xf32>
    %124 = vector.shape_cast %123 : vector<8xf32> to vector<8x1xf32>
    %cst_40 = arith.constant 8.000000e+00 : f32
    %125 = vector.broadcast %cst_40 : f32 to vector<8x1xf32>
    %126 = arith.divf %124, %125 : vector<8x1xf32>
    %127 = arith.subf %122, %126 : vector<8x1xf32>
    %cst_41 = arith.constant dense<0.000000e+00> : vector<1x8xf32>
    %128 = tpu.matmul %127, %14, %cst_41 {dimension_numbers = #tpu.dot_dimension_numbers<[0], [0], [1], [1], [0, 1, 1, 1], [], []>, precision = #tpu.contract_precision<fp32>} : vector<8x1xf32>, vector<8x8xf32>, vector<1x8xf32> -> vector<1x8xf32>
    %129 = vector.broadcast %128 : vector<1x8xf32> to vector<8x8xf32>
    %130 = vector.broadcast %127 : vector<8x1xf32> to vector<8x8xf32>
    %131 = arith.cmpf ogt, %129, %130 : vector<8x8xf32>
    %132 = arith.extui %131 : vector<8x8xi1> to vector<8x8xi32>
    %133 = arith.sitofp %132 : vector<8x8xi32> to vector<8x8xf32>
    %cst_42 = arith.constant dense<0.000000e+00> : vector<8xf32>
    %134 = vector.multi_reduction <add>, %133, %cst_42 [1] : vector<8x8xf32> to vector<8xf32>
    %135 = vector.shape_cast %134 : vector<8xf32> to vector<8x1xf32>
    %cst_43 = arith.constant 1.500000e+00 : f32
    %136 = vector.broadcast %cst_43 : f32 to vector<8x1xf32>
    %137 = arith.cmpf olt, %135, %136 : vector<8x1xf32>
    %138 = vector.broadcast %122 : vector<8x1xf32> to vector<8x8xf32>
    %139 = arith.subf %120, %138 : vector<8x8xf32>
    %cst_44 = arith.constant 0.000000e+00 : f32
    %140 = vector.shape_cast %137 : vector<8x1xi1> to vector<8x1xi1>
    %141 = vector.broadcast %140 : vector<8x1xi1> to vector<8x8xi1>
    %142 = vector.broadcast %cst_44 : f32 to vector<8x8xf32>
    %143 = arith.select %141, %139, %142 : vector<8x8xi1>, vector<8x8xf32>
    %144 = math.exp %143 : vector<8x8xf32>
    %cst_45 = arith.constant dense<0.000000e+00> : vector<8xf32>
    %145 = vector.multi_reduction <add>, %144, %cst_45 [1] : vector<8x8xf32> to vector<8xf32>
    %146 = vector.shape_cast %145 : vector<8xf32> to vector<8x1xf32>
    %147 = tpu.reciprocal %146 {approx = true} : vector<8x1xf32> -> vector<8x1xf32>
    %148 = vector.broadcast %147 : vector<8x1xf32> to vector<8x8xf32>
    %149 = arith.mulf %144, %148 : vector<8x8xf32>
    %cst_46 = arith.constant dense<0.000000e+00> : vector<8x8xf32>
    %150 = tpu.matmul %149, %119, %cst_46 {dimension_numbers = #tpu.dot_dimension_numbers<[1], [0], [0], [1], [0, 0, 1, 1], [], []>} : vector<8x8xf32>, vector<8x8xf32>, vector<8x8xf32> -> vector<8x8xf32>
    %151 = tpu.concatenate %48, %82, %116, %150 in 1 : vector<8x8xf32>, vector<8x8xf32>, vector<8x8xf32>, vector<8x8xf32> -> vector<8x32xf32>
    %c0_47 = arith.constant 0 : index
    %c0_48 = arith.constant 0 : index
    %152 = vector.load %arg4[%c0_47, %c0_48] : memref<32x32xf32, #tpu.memory_space<vmem>>, vector<32x32xf32>
    %cst_49 = arith.constant dense<0.000000e+00> : vector<8x32xf32>
    %153 = tpu.matmul %151, %152, %cst_49 {dimension_numbers = #tpu.dot_dimension_numbers<[1], [0], [0], [1], [0, 0, 1, 1], [], []>} : vector<8x32xf32>, vector<32x32xf32>, vector<8x32xf32> -> vector<8x32xf32>
    %c0_50 = arith.constant 0 : index
    %c0_51 = arith.constant 0 : index
    %154 = vector.load %arg5[%c0_50, %c0_51] : memref<1x32xf32, #tpu.memory_space<vmem>>, vector<1x32xf32>
    %155 = vector.broadcast %154 : vector<1x32xf32> to vector<8x32xf32>
    %156 = arith.addf %153, %155 : vector<8x32xf32>
    %157 = arith.addf %1, %156 : vector<8x32xf32>
    %c0_52 = arith.constant 0 : index
    %c0_53 = arith.constant 0 : index
    %158 = vector.load %arg6[%c0_52, %c0_53] : memref<1x32xf32, #tpu.memory_space<vmem>>, vector<1x32xf32>
    %c0_54 = arith.constant 0 : index
    %c0_55 = arith.constant 0 : index
    %159 = vector.load %arg7[%c0_54, %c0_55] : memref<1x32xf32, #tpu.memory_space<vmem>>, vector<1x32xf32>
    %cst_56 = arith.constant dense<0.000000e+00> : vector<8xf32>
    %160 = vector.multi_reduction <add>, %157, %cst_56 [1] : vector<8x32xf32> to vector<8xf32>
    %161 = vector.shape_cast %160 : vector<8xf32> to vector<8x1xf32>
    %cst_57 = arith.constant 3.200000e+01 : f32
    %162 = vector.broadcast %cst_57 : f32 to vector<8x1xf32>
    %163 = arith.divf %161, %162 : vector<8x1xf32>
    %164 = vector.broadcast %163 : vector<8x1xf32> to vector<8x32xf32>
    %165 = arith.subf %157, %164 : vector<8x32xf32>
    %166 = arith.mulf %165, %165 : vector<8x32xf32>
    %cst_58 = arith.constant dense<0.000000e+00> : vector<8xf32>
    %167 = vector.multi_reduction <add>, %166, %cst_58 [1] : vector<8x32xf32> to vector<8xf32>
    %168 = vector.shape_cast %167 : vector<8xf32> to vector<8x1xf32>
    %cst_59 = arith.constant 3.200000e+01 : f32
    %169 = vector.broadcast %cst_59 : f32 to vector<8x1xf32>
    %170 = arith.divf %168, %169 : vector<8x1xf32>
    %171 = vector.broadcast %163 : vector<8x1xf32> to vector<8x32xf32>
    %172 = arith.subf %157, %171 : vector<8x32xf32>
    %cst_60 = arith.constant 9.99999974E-6 : f32
    %173 = vector.broadcast %cst_60 : f32 to vector<8x1xf32>
    %174 = arith.addf %170, %173 : vector<8x1xf32>
    %175 = math.rsqrt %174 : vector<8x1xf32>
    %176 = vector.broadcast %175 : vector<8x1xf32> to vector<8x32xf32>
    %177 = arith.mulf %172, %176 : vector<8x32xf32>
    %178 = vector.broadcast %158 : vector<1x32xf32> to vector<8x32xf32>
    %179 = arith.mulf %177, %178 : vector<8x32xf32>
    %180 = vector.broadcast %159 : vector<1x32xf32> to vector<8x32xf32>
    %181 = arith.addf %179, %180 : vector<8x32xf32>
    %c0_61 = arith.constant 0 : index
    %c0_62 = arith.constant 0 : index
    %182 = vector.load %arg8[%c0_61, %c0_62] : memref<32x64xf32, #tpu.memory_space<vmem>>, vector<32x64xf32>
    %cst_63 = arith.constant dense<0.000000e+00> : vector<8x64xf32>
    %183 = tpu.matmul %181, %182, %cst_63 {dimension_numbers = #tpu.dot_dimension_numbers<[1], [0], [0], [1], [0, 0, 1, 1], [], []>} : vector<8x32xf32>, vector<32x64xf32>, vector<8x64xf32> -> vector<8x64xf32>
    %c0_64 = arith.constant 0 : index
    %c0_65 = arith.constant 0 : index
    %184 = vector.load %arg9[%c0_64, %c0_65] : memref<1x64xf32, #tpu.memory_space<vmem>>, vector<1x64xf32>
    %185 = vector.broadcast %184 : vector<1x64xf32> to vector<8x64xf32>
    %186 = arith.addf %183, %185 : vector<8x64xf32>
    %cst_66 = arith.constant 5.000000e-01 : f32
    %187 = vector.broadcast %cst_66 : f32 to vector<8x64xf32>
    %188 = arith.mulf %187, %186 : vector<8x64xf32>
    %cst_67 = arith.constant 0.707106769 : f32
    %189 = vector.broadcast %cst_67 : f32 to vector<8x64xf32>
    %190 = arith.mulf %186, %189 : vector<8x64xf32>
    %191 = math.erf %190 : vector<8x64xf32>
    %cst_68 = arith.constant 1.000000e+00 : f32
    %192 = vector.broadcast %cst_68 : f32 to vector<8x64xf32>
    %193 = arith.addf %192, %191 : vector<8x64xf32>
    %194 = arith.mulf %188, %193 : vector<8x64xf32>
    %c0_69 = arith.constant 0 : index
    %c0_70 = arith.constant 0 : index
    %195 = vector.load %arg10[%c0_69, %c0_70] : memref<64x32xf32, #tpu.memory_space<vmem>>, vector<64x32xf32>
    %cst_71 = arith.constant dense<0.000000e+00> : vector<8x32xf32>
    %196 = tpu.matmul %194, %195, %cst_71 {dimension_numbers = #tpu.dot_dimension_numbers<[1], [0], [0], [1], [0, 0, 1, 1], [], []>} : vector<8x64xf32>, vector<64x32xf32>, vector<8x32xf32> -> vector<8x32xf32>
    %c0_72 = arith.constant 0 : index
    %c0_73 = arith.constant 0 : index
    %197 = vector.load %arg11[%c0_72, %c0_73] : memref<1x32xf32, #tpu.memory_space<vmem>>, vector<1x32xf32>
    %198 = vector.broadcast %197 : vector<1x32xf32> to vector<8x32xf32>
    %199 = arith.addf %196, %198 : vector<8x32xf32>
    %200 = arith.addf %181, %199 : vector<8x32xf32>
    %c0_74 = arith.constant 0 : index
    %c0_75 = arith.constant 0 : index
    %201 = vector.load %arg12[%c0_74, %c0_75] : memref<1x32xf32, #tpu.memory_space<vmem>>, vector<1x32xf32>
    %c0_76 = arith.constant 0 : index
    %c0_77 = arith.constant 0 : index
    %202 = vector.load %arg13[%c0_76, %c0_77] : memref<1x32xf32, #tpu.memory_space<vmem>>, vector<1x32xf32>
    %cst_78 = arith.constant dense<0.000000e+00> : vector<8xf32>
    %203 = vector.multi_reduction <add>, %200, %cst_78 [1] : vector<8x32xf32> to vector<8xf32>
    %204 = vector.shape_cast %203 : vector<8xf32> to vector<8x1xf32>
    %cst_79 = arith.constant 3.200000e+01 : f32
    %205 = vector.broadcast %cst_79 : f32 to vector<8x1xf32>
    %206 = arith.divf %204, %205 : vector<8x1xf32>
    %207 = vector.broadcast %206 : vector<8x1xf32> to vector<8x32xf32>
    %208 = arith.subf %200, %207 : vector<8x32xf32>
    %209 = arith.mulf %208, %208 : vector<8x32xf32>
    %cst_80 = arith.constant dense<0.000000e+00> : vector<8xf32>
    %210 = vector.multi_reduction <add>, %209, %cst_80 [1] : vector<8x32xf32> to vector<8xf32>
    %211 = vector.shape_cast %210 : vector<8xf32> to vector<8x1xf32>
    %cst_81 = arith.constant 3.200000e+01 : f32
    %212 = vector.broadcast %cst_81 : f32 to vector<8x1xf32>
    %213 = arith.divf %211, %212 : vector<8x1xf32>
    %214 = vector.broadcast %206 : vector<8x1xf32> to vector<8x32xf32>
    %215 = arith.subf %200, %214 : vector<8x32xf32>
    %cst_82 = arith.constant 9.99999974E-6 : f32
    %216 = vector.broadcast %cst_82 : f32 to vector<8x1xf32>
    %217 = arith.addf %213, %216 : vector<8x1xf32>
    %218 = math.rsqrt %217 : vector<8x1xf32>
    %219 = vector.broadcast %218 : vector<8x1xf32> to vector<8x32xf32>
    %220 = arith.mulf %215, %219 : vector<8x32xf32>
    %221 = vector.broadcast %201 : vector<1x32xf32> to vector<8x32xf32>
    %222 = arith.mulf %220, %221 : vector<8x32xf32>
    %223 = vector.broadcast %202 : vector<1x32xf32> to vector<8x32xf32>
    %224 = arith.addf %222, %223 : vector<8x32xf32>
    %225 = vector.extract_strided_slice %224 {offsets = [7, 0], sizes = [1, 32], strides = [1, 1]} : vector<8x32xf32> to vector<1x32xf32>
    %226 = vector.extract_strided_slice %224 {offsets = [0, 0], sizes = [7, 32], strides = [1, 1]} : vector<8x32xf32> to vector<7x32xf32>
    %227 = tpu.concatenate %225, %226 in 0 : vector<1x32xf32>, vector<7x32xf32> -> vector<8x32xf32>
    %228 = vector.extract_strided_slice %224 {offsets = [1, 0], sizes = [7, 32], strides = [1, 1]} : vector<8x32xf32> to vector<7x32xf32>
    %229 = vector.extract_strided_slice %224 {offsets = [0, 0], sizes = [1, 32], strides = [1, 1]} : vector<8x32xf32> to vector<1x32xf32>
    %230 = tpu.concatenate %228, %229 in 0 : vector<7x32xf32>, vector<1x32xf32> -> vector<8x32xf32>
    %231 = tpu.concatenate %227, %224, %230 in 1 : vector<8x32xf32>, vector<8x32xf32>, vector<8x32xf32> -> vector<8x96xf32>
    %c0_83 = arith.constant 0 : index
    %c0_84 = arith.constant 0 : index
    %232 = vector.load %arg14[%c0_83, %c0_84] : memref<96x32xf32, #tpu.memory_space<vmem>>, vector<96x32xf32>
    %cst_85 = arith.constant dense<0.000000e+00> : vector<8x32xf32>
    %233 = tpu.matmul %231, %232, %cst_85 {dimension_numbers = #tpu.dot_dimension_numbers<[1], [0], [0], [1], [0, 0, 1, 1], [], []>} : vector<8x96xf32>, vector<96x32xf32>, vector<8x32xf32> -> vector<8x32xf32>
    %c0_86 = arith.constant 0 : index
    %c0_87 = arith.constant 0 : index
    %234 = vector.load %arg15[%c0_86, %c0_87] : memref<1x32xf32, #tpu.memory_space<vmem>>, vector<1x32xf32>
    %235 = vector.broadcast %234 : vector<1x32xf32> to vector<8x32xf32>
    %236 = arith.addf %233, %235 : vector<8x32xf32>
    %cst_88 = arith.constant -1.000000e+30 : f32
    %237 = vector.broadcast %cst_88 : f32 to vector<1x32xf32>
    %238 = vector.extract_strided_slice %236 {offsets = [0, 0], sizes = [7, 32], strides = [1, 1]} : vector<8x32xf32> to vector<7x32xf32>
    %239 = tpu.concatenate %237, %238 in 0 : vector<1x32xf32>, vector<7x32xf32> -> vector<8x32xf32>
    %240 = vector.extract_strided_slice %236 {offsets = [1, 0], sizes = [7, 32], strides = [1, 1]} : vector<8x32xf32> to vector<7x32xf32>
    %241 = tpu.concatenate %240, %237 in 0 : vector<7x32xf32>, vector<1x32xf32> -> vector<8x32xf32>
    %242 = arith.maximumf %239, %236 : vector<8x32xf32>
    %243 = arith.maximumf %242, %241 : vector<8x32xf32>
    %244 = tpu.iota {dimensions = array<i32: 0>} : vector<4x8xi32>
    %245 = tpu.iota {dimensions = array<i32: 1>} : vector<4x8xi32>
    %c2_i32 = arith.constant 2 : i32
    %246 = vector.broadcast %c2_i32 : i32 to vector<4x8xi32>
    %247 = arith.muli %246, %244 : vector<4x8xi32>
    %248 = arith.cmpi eq, %245, %247 : vector<4x8xi32>
    %249 = arith.extui %248 : vector<4x8xi1> to vector<4x8xi32>
    %250 = arith.sitofp %249 : vector<4x8xi32> to vector<4x8xf32>
    %cst_89 = arith.constant dense<0.000000e+00> : vector<4x32xf32>
    %251 = tpu.matmul %250, %243, %cst_89 {dimension_numbers = #tpu.dot_dimension_numbers<[1], [0], [0], [1], [0, 0, 1, 1], [], []>, precision = #tpu.contract_precision<fp32>} : vector<4x8xf32>, vector<8x32xf32>, vector<4x32xf32> -> vector<4x32xf32>
    %cst_90 = arith.constant 0.000000e+00 : f32
    %252 = vector.broadcast %cst_90 : f32 to vector<4x32xf32>
    %253 = arith.cmpf ogt, %251, %252 : vector<4x32xf32>
    %cst_91 = arith.constant 0.000000e+00 : f32
    %254 = vector.broadcast %cst_91 : f32 to vector<4x32xf32>
    %255 = arith.minimumf %251, %254 : vector<4x32xf32>
    %256 = math.exp %255 : vector<4x32xf32>
    %cst_92 = arith.constant 1.000000e+00 : f32
    %257 = vector.broadcast %cst_92 : f32 to vector<4x32xf32>
    %258 = arith.subf %256, %257 : vector<4x32xf32>
    %259 = arith.select %253, %251, %258 : vector<4x32xi1>, vector<4x32xf32>
    %c0_93 = arith.constant 0 : index
    %c0_94 = arith.constant 0 : index
    %260 = vector.load %arg16[%c0_93, %c0_94] : memref<1x32xf32, #tpu.memory_space<vmem>>, vector<1x32xf32>
    %c0_95 = arith.constant 0 : index
    %c0_96 = arith.constant 0 : index
    %261 = vector.load %arg17[%c0_95, %c0_96] : memref<1x32xf32, #tpu.memory_space<vmem>>, vector<1x32xf32>
    %cst_97 = arith.constant dense<0.000000e+00> : vector<4xf32>
    %262 = vector.multi_reduction <add>, %259, %cst_97 [1] : vector<4x32xf32> to vector<4xf32>
    %263 = vector.shape_cast %262 : vector<4xf32> to vector<4x1xf32>
    %cst_98 = arith.constant 3.200000e+01 : f32
    %264 = vector.broadcast %cst_98 : f32 to vector<4x1xf32>
    %265 = arith.divf %263, %264 : vector<4x1xf32>
    %266 = vector.broadcast %265 : vector<4x1xf32> to vector<4x32xf32>
    %267 = arith.subf %259, %266 : vector<4x32xf32>
    %268 = arith.mulf %267, %267 : vector<4x32xf32>
    %cst_99 = arith.constant dense<0.000000e+00> : vector<4xf32>
    %269 = vector.multi_reduction <add>, %268, %cst_99 [1] : vector<4x32xf32> to vector<4xf32>
    %270 = vector.shape_cast %269 : vector<4xf32> to vector<4x1xf32>
    %cst_100 = arith.constant 3.200000e+01 : f32
    %271 = vector.broadcast %cst_100 : f32 to vector<4x1xf32>
    %272 = arith.divf %270, %271 : vector<4x1xf32>
    %273 = vector.broadcast %265 : vector<4x1xf32> to vector<4x32xf32>
    %274 = arith.subf %259, %273 : vector<4x32xf32>
    %cst_101 = arith.constant 9.99999974E-6 : f32
    %275 = vector.broadcast %cst_101 : f32 to vector<4x1xf32>
    %276 = arith.addf %272, %275 : vector<4x1xf32>
    %277 = math.rsqrt %276 : vector<4x1xf32>
    %278 = vector.broadcast %277 : vector<4x1xf32> to vector<4x32xf32>
    %279 = arith.mulf %274, %278 : vector<4x32xf32>
    %280 = vector.broadcast %260 : vector<1x32xf32> to vector<4x32xf32>
    %281 = arith.mulf %279, %280 : vector<4x32xf32>
    %282 = vector.broadcast %261 : vector<1x32xf32> to vector<4x32xf32>
    %283 = arith.addf %281, %282 : vector<4x32xf32>
    %c0_102 = arith.constant 0 : index
    %c0_103 = arith.constant 0 : index
    %c0_104 = arith.constant 0 : index
    %284 = vector.load %arg18[%c0_102, %c0_103, %c0_104] : memref<1x4x32xf32, #tpu.memory_space<vmem>>, vector<1x4x32xf32>
    %285 = vector.shape_cast %284 : vector<1x4x32xf32> to vector<4x32xf32>
    %286 = vector.shape_cast %283 : vector<4x32xf32> to vector<1x4x32xf32>
    tpu.vector_store %arg18[%c0_102, %c0_103, %c0_104], %286 {strides = array<i32>} : memref<1x4x32xf32, #tpu.memory_space<vmem>>, vector<1x4x32xf32>,
    return
  }
  func.func @transform_0(%arg0: i32) -> (i32, i32, i32) {
    %c0_i32 = arith.constant 0 : i32
    %c0_i32_0 = arith.constant 0 : i32
    %c0_i32_1 = arith.constant 0 : i32
    return %arg0, %c0_i32, %c0_i32_0 : i32, i32, i32
  }
  func.func @transform_1(%arg0: i32) -> (i32, i32) {
    %c0_i32 = arith.constant 0 : i32
    %c0_i32_0 = arith.constant 0 : i32
    %c0_i32_1 = arith.constant 0 : i32
    return %c0_i32, %c0_i32_0 : i32, i32
  }
  func.func @transform_2(%arg0: i32) -> (i32, i32) {
    %c0_i32 = arith.constant 0 : i32
    %c0_i32_0 = arith.constant 0 : i32
    %c0_i32_1 = arith.constant 0 : i32
    return %c0_i32, %c0_i32_0 : i32, i32
  }
  func.func @transform_3(%arg0: i32) -> (i32, i32) {
    %c0_i32 = arith.constant 0 : i32
    %c0_i32_0 = arith.constant 0 : i32
    %c0_i32_1 = arith.constant 0 : i32
    return %c0_i32, %c0_i32_0 : i32, i32
  }
  func.func @transform_4(%arg0: i32) -> (i32, i32) {
    %c0_i32 = arith.constant 0 : i32
    %c0_i32_0 = arith.constant 0 : i32
    %c0_i32_1 = arith.constant 0 : i32
    return %c0_i32, %c0_i32_0 : i32, i32
  }
  func.func @transform_5(%arg0: i32) -> (i32, i32) {
    %c0_i32 = arith.constant 0 : i32
    %c0_i32_0 = arith.constant 0 : i32
    %c0_i32_1 = arith.constant 0 : i32
    return %c0_i32, %c0_i32_0 : i32, i32
  }
  func.func @transform_6(%arg0: i32) -> (i32, i32) {
    %c0_i32 = arith.constant 0 : i32
    %c0_i32_0 = arith.constant 0 : i32
    %c0_i32_1 = arith.constant 0 : i32
    return %c0_i32, %c0_i32_0 : i32, i32
  }
  func.func @transform_7(%arg0: i32) -> (i32, i32) {
    %c0_i32 = arith.constant 0 : i32
    %c0_i32_0 = arith.constant 0 : i32
    %c0_i32_1 = arith.constant 0 : i32
    return %c0_i32, %c0_i32_0 : i32, i32
  }
  func.func @transform_8(%arg0: i32) -> (i32, i32) {
    %c0_i32 = arith.constant 0 : i32
    %c0_i32_0 = arith.constant 0 : i32
    %c0_i32_1 = arith.constant 0 : i32
    return %c0_i32, %c0_i32_0 : i32, i32
  }
  func.func @transform_9(%arg0: i32) -> (i32, i32) {
    %c0_i32 = arith.constant 0 : i32
    %c0_i32_0 = arith.constant 0 : i32
    %c0_i32_1 = arith.constant 0 : i32
    return %c0_i32, %c0_i32_0 : i32, i32
  }
  func.func @transform_10(%arg0: i32) -> (i32, i32) {
    %c0_i32 = arith.constant 0 : i32
    %c0_i32_0 = arith.constant 0 : i32
    %c0_i32_1 = arith.constant 0 : i32
    return %c0_i32, %c0_i32_0 : i32, i32
  }
  func.func @transform_11(%arg0: i32) -> (i32, i32) {
    %c0_i32 = arith.constant 0 : i32
    %c0_i32_0 = arith.constant 0 : i32
    %c0_i32_1 = arith.constant 0 : i32
    return %c0_i32, %c0_i32_0 : i32, i32
  }
  func.func @transform_12(%arg0: i32) -> (i32, i32) {
    %c0_i32 = arith.constant 0 : i32
    %c0_i32_0 = arith.constant 0 : i32
    %c0_i32_1 = arith.constant 0 : i32
    return %c0_i32, %c0_i32_0 : i32, i32
  }
  func.func @transform_13(%arg0: i32) -> (i32, i32) {
    %c0_i32 = arith.constant 0 : i32
    %c0_i32_0 = arith.constant 0 : i32
    %c0_i32_1 = arith.constant 0 : i32
    return %c0_i32, %c0_i32_0 : i32, i32
  }
  func.func @transform_14(%arg0: i32) -> (i32, i32) {
    %c0_i32 = arith.constant 0 : i32
    %c0_i32_0 = arith.constant 0 : i32
    %c0_i32_1 = arith.constant 0 : i32
    return %c0_i32, %c0_i32_0 : i32, i32
  }
  func.func @transform_15(%arg0: i32) -> (i32, i32) {
    %c0_i32 = arith.constant 0 : i32
    %c0_i32_0 = arith.constant 0 : i32
    %c0_i32_1 = arith.constant 0 : i32
    return %c0_i32, %c0_i32_0 : i32, i32
  }
  func.func @transform_16(%arg0: i32) -> (i32, i32) {
    %c0_i32 = arith.constant 0 : i32
    %c0_i32_0 = arith.constant 0 : i32
    %c0_i32_1 = arith.constant 0 : i32
    return %c0_i32, %c0_i32_0 : i32, i32
  }
  func.func @transform_17(%arg0: i32) -> (i32, i32, i32) {
    %c0_i32 = arith.constant 0 : i32
    %c0_i32_0 = arith.constant 0 : i32
    %c0_i32_1 = arith.constant 0 : i32
    return %arg0, %c0_i32, %c0_i32_0 : i32, i32, i32
  }
}

</mosaic_0001>

<bundles_post_ra>
// kernel: tpu_custom_call.1
= control target key start
LH: loop header
LB: loop body
LE: loop exit
PB: predicated region body
PF: predicated region fallthrough
CT: control target
= control target key end

     0   :  { %s3428_s0 = inlined_call_operand.vmem [shape: f32[2,8,32], index: 0, kind: input, shape index: {}]   ;;  %s3429_s1 = inlined_call_operand.vmem [shape: f32[32,96], index: 1, kind: input, shape index: {}]   ;;  %s3430_s2 = inlined_call_operand.vmem [shape: f32[1,96], index: 2, kind: input, shape index: {}]   ;;  %s3431_s3 = inlined_call_operand.vmem [shape: f32[32,32], index: 3, kind: input, shape index: {}]   ;;  %s3432_s4 = inlined_call_operand.vmem [shape: f32[1,32], index: 4, kind: input, shape index: {}]   ;;  %s3433_s5 = inlined_call_operand.vmem [shape: f32[1,32], index: 5, kind: input, shape index: {}]   ;;  %s3434_s6 = inlined_call_operand.vmem [shape: f32[1,32], index: 6, kind: input, shape index: {}]   ;;  %s3435_s7 = inlined_call_operand.vmem [shape: f32[32,64], index: 7, kind: input, shape index: {}]   ;;  %s3436_s8 = inlined_call_operand.vmem [shape: f32[1,64], index: 8, kind: input, shape index: {}]   ;;  %s3437_s9 = inlined_call_operand.vmem [shape: f32[64,32], index: 9, kind: input, shape index: {}]   ;;  %s3438_s10 = inlined_call_operand.vmem [shape: f32[1,32], index: 10, kind: input, shape index: {}]   ;;  %s3439_s11 = inlined_call_operand.vmem [shape: f32[1,32], index: 11, kind: input, shape index: {}]   ;;  %s3440_s12 = inlined_call_operand.vmem [shape: f32[1,32], index: 12, kind: input, shape index: {}]   ;;  %s3441_s13 = inlined_call_operand.vmem [shape: f32[96,32], index: 13, kind: input, shape index: {}]   ;;  %s3442_s14 = inlined_call_operand.vmem [shape: f32[1,32], index: 14, kind: input, shape index: {}]   ;;  %s3443_s15 = inlined_call_operand.vmem [shape: f32[1,32], index: 15, kind: input, shape index: {}]   ;;  %s3444_s16 = inlined_call_operand.vmem [shape: f32[1,32], index: 16, kind: input, shape index: {}]   ;;  %s3445_s17 = inlined_call_operand.hbm [shape: f32[2,4,32], index: 17, kind: output, shape index: {}]  }
   0x1   :  { %3453 = sst [smem:[#allocation11_spill]] %s3428_s0 }
   0x2   :  { %3454 = sst [smem:[#allocation12_spill]] %s3429_s1 }
   0x3   :  { %3455 = sst [smem:[#allocation13_spill]] %s3430_s2 }
   0x4   :  { %3456 = sst [smem:[#allocation14_spill]] %s3431_s3 }
   0x5   :  { %22 = vsyncpa [#allocation3], 0 }
   0x6   :  { %24 = vsyncpa [#allocation3 + $0x1], 0  ;;  %s3026_s24 = smov 0   ;;  %s3028_s25 = smov 0  }
   0x7   :  { %s3030_s26 = smov 0   ;;  %s3032_s27 = smov 0  }
   0x8 LB: > { %3457 = sst [smem:[#allocation5_spill]] %s2903_s24  ;;  %s3047_s28 = sadd.s32 4294967295, %s2915_s27   ;;  %s2915_s27 = sphi %s3032_s27, %s3474_s27   ;;  %s2911_s26 = sphi %s3030_s26, %s3476_s26   ;;  %s2907_s25 = sphi %s3028_s25, %s3478_s25   ;;  %s2903_s24 = sphi %s3026_s24, %s3477_s24  }
   0x9   : > { %3458 = sst [smem:[#allocation6_spill]] %s2911_s26  ;;  %s2712_s29 = sadd.s32 4294967294, %s2915_s27  }
   0xa   : > { %3459 = sst [smem:[#allocation7_spill]] %s2915_s27  ;;  %s3051_s0 = sadd.s32 1, %s2915_s27  }
   0xb   : > { %3460 = sst [smem:[#allocation8_spill]] %s3051_s0  ;;  %s399_s30 = sadd.s32 1, %s2911_s26 }
   0xc   : > { %s396_s18 = ssub.s32 %s2915_s27, %s3051_s0  ;;  %p409_p0 = scmp.ne.s32.totalorder %s2911_s26, %s2907_s25 }
   0xd   : > { %p397_p1 = scmp.eq.s32.totalorder %s396_s18, 0  ;;  %p410_p2 = scmp.eq.s32.totalorder %s3047_s28, 1 }
   0xe   : > { %p415_p3 = scmp.ne.s32.totalorder %s2907_s25, %s2903_s24  ;;  %p416_p4 = scmp.eq.s32.totalorder %s2712_s29, 1 }
   0xf   : > { %s3062_s19 = scalar_select %p397_p1, %s2911_s26, %s399_s30  }
  0x10   : > { %p3064_p5 = por %p410_p2, %p409_p0  ;;  %p3068_p6 = por %p416_p4, %p415_p3 }
  0x11   : > { %3461 = sst [smem:[#allocation9_spill]] %s3062_s19  ;;  %p2715_p7 = scmp.ge.s32.totalorder %s2915_s27, 1 }
  0x12   : > { %s3463_s20 = scalar_select %p3068_p6, 1, 0 }
  0x13   : > { %p489_p8 = scmp.lt.s32.totalorder %s2915_s27, 3 }
  0x14   : > { %3464 = sst [smem:[#allocation10_spill]] %s3463_s20 }
  0x15   : > { %p490_p9 = pnand %p2715_p7, %p489_p8 }
  0x16   : > { %s3465_s23 = sld [smem:[#allocation12_spill]] (!%p490_p9)  ;;  %p540_p10 = scmp.lt.s32.totalorder (!%p490_p9), %s3047_s28, 1 }
  0x17   : > { %493 = sbr.rel (%p490_p9) target bundleno = 5552 (0x15b0), region = 88  ;;  %s3466_s27 = sld [smem:[#allocation11_spill]] (!%p490_p9) }
  0x18   : > { %s3467_s2 = sld [smem:[#allocation13_spill]] (!%p490_p9)  ;;  %s2917_s0 = smov (!%p490_p9), 96  }
  0x19   : > { %s2918_s24 = smov (!%p490_p9), 120   ;;  %s2924_s20 = smov (!%p490_p9), 112  }
  0x1a   : > { %s2925_s18 = smov (!%p490_p9), 80   ;;  %s2927_s22 = smov (!%p490_p9), 72  }
  0x1b   : > { %s2929_s19 = smov (!%p490_p9), 48   ;;  %s2930_s30 = smov (!%p490_p9), 8  }
  0x1c   : > { %v548_v0 = vld [vmem:[%s3465_s23 + $0x18] sm:$0xff]  ;;  %v547_v1 = vld [vmem:[%s3465_s23 + $0x10] sm:$0xff]  ;;  %v546_v2 = vld [vmem:[%s3465_s23 + $0x8] sm:$0xff]  ;;  %s541_s26 = scalar_select %p540_p10, %s3047_s28, 1  ;;  %vm553_vm0 = vcmask 261120   ;;  %vm588_vm1 = vcmask 64512   ;;  %v578_v46 = vlaneseq }
  0x1d   : > { %569 = vmatpush.msra.mxu0 %v548_v0  ;;  %v545_v3 = vld [vmem:[%s3465_s23] sm:$0xff]  ;;  %v2919_v35 = vmov 8.0   ;;  %v2920_v50 = vmov 0.0   ;;  %v2921_v56 = vmov 1.0   ;;  %s3470_s3 = sld [smem:[#allocation14_spill]]  ;;  %vm2158_vm12 = vcmask 130048  }
  0x1e   : > { %s2717_s21 = sshll.u32 %s541_s26, 3  ;;  %v2812_v5 = vld [vmem:[%s3467_s2] ss:$0 sm:$0xff]  ;;  %2823 = vrcp.f32 %v2919_v35  ;;  %v3117_v47 = vshrl.u32 %v578_v46, 7  ;;  %v3119_v48 = vand.u32 127, %v578_v46  ;;  %s2922_s26 = smov 88  }
  0x1f   : > { %570 = vmatpush.msra.mxu0 %v547_v1  ;;  %s543_s29 = scalar_lea.vmem %s3466_s27, %s2717_s21  ;;  %s2923_s27 = smov 64   ;;  %vm2160_vm13 = vcmask 195584  }
  0x20   : > { %v3091_v4 = vld [vmem:[%s543_s29] sm:$0xff]  ;;  %vm3123_vm3 = vcmp.eq.s32.totalorder %v3117_v47, %v3119_v48  ;;  %s2926_s21 = smov 56   ;;  %s2928_s29 = smov 104  }
  0x21   : > { %571 = vmatpush.msra.mxu0 %v546_v2  ;;  %v2719_v51 = vsel %vm3123_vm3, 1.0, %v2920_v50 }
  0x22   : > { %v3130_v52 = vsub.f32 %v2719_v51, %v2719_v51 }
  0x23   : > { %572 = vmatpush.msra.mxu0 %v545_v3 }
  0x24   : > { %2718 = vmatmul.msk.f32.vlgmr.msra.gmra.mxu0 %vm553_vm0, %v3091_v4  ;;  %v2824_v36 = vpop.eup %2823  ;;  %v3133_v53 = vand.u32 4294901760, %v3130_v52 }
  0x25   : > { %v747_v37 = vmul.f32 8.0, %v2824_v36  ;;  %vm751_vm2 = vweird.f32 %v2824_v36  ;;  %2720 = vmatpush.msk.msrb.mxu0 %vm3123_vm3, %v2921_v56 }
  0x26   : > { %v834_v54 = vsub.f32 %v3130_v52, %v3133_v53 }
  0x27   : > { %v748_v38 = vsub.f32 1.0, %v747_v37  ;;  %908 = vmatpush.msra.mxu0 %v3133_v53 }
  0x28   : > { %v3138_v55 = vand.u32 4294901760, %v834_v54 }
  0x29   : > { %v749_v39 = vmul.f32 %v2824_v36, %v748_v38 }
  0x2b   : > { %v750_v40 = vadd.f32 %v2824_v36, %v749_v39 }
  0x2d   : > { %v3114_v41 = vsel %vm751_vm2, %v2824_v36, %v750_v40 }
  0xa1   : > { %v574_v6 = vpop.f32.mrf.mxu0 }
  0xa2   : > { %v3098_v7 = vadd.f32 %v2812_v5, %v574_v6 }
  0xa4   : > { %586 = vrot.lane.b32.xlu0 %v3098_v7, %s2917_s0  ;;  %v3102_v8 = vmul.f32 0.35355338, %v3098_v7  ;;  %s2931_s0 = smov 40  }
  0xa6   : > { %981 = vrot.lane.b32.xlu2 %v3102_v8, %s2918_s24  ;;  %v590_v9 = vsel %vm588_vm1, %v3102_v8, 0  ;;  %s2932_s24 = smov 16  }
  0xa7   : > { %v611_v10 = vand.u32 4294901760, %v590_v9 }
  0xa9   : > { %v612_v11 = vsub.f32 %v590_v9, %v611_v10 }
  0xab   : > { %v613_v12 = vand.u32 4294901760, %v612_v11 }
  0xad   : > { %v614_v15 = vsub.f32 %v612_v11, %v613_v12 }
  0xaf   : > { %v615_v18 = vand.u32 4294901760, %v614_v15 }
 0x116   : > { %v587_v13 = vpop.permute.xlu0 %586 }
 0x117   : > { %v592_v14 = vsel %vm588_vm1, %v587_v13, 0 }
 0x118   : > { %v609_v16 = vand.u32 4294901760, %v592_v14 }
 0x11a   : > { %v636_v17 = vsub.f32 %v592_v14, %v609_v16  ;;  %610 = vmatpush.xpose.msra.mxu1 %v609_v16 }
 0x11c   : > { %663 = vmatpush.xpose.msra.mxu3 %v636_v17  ;;  %v637_v19 = vand.u32 4294901760, %v636_v17 }
 0x11d   : > { %616 = vmatmul.f32.vlgmr.msra.gmra.mxu1 %v615_v18 }
 0x11e   : > { %686 = vmatpush.xpose.msrb.mxu1 %v609_v16  ;;  %v638_v20 = vsub.f32 %v636_v17, %v637_v19  ;;  %v982_v17 = vpop.permute.xlu2 %981 }
 0x11f   : > { %666 = vmatmul.f32.vlgmr.msra.gmra.mxu3 %v612_v11  ;;  %v985_v18 = vsel %vm588_vm1, %v982_v17, 0 }
 0x120   : > { %734 = vmatpush.xpose.msrb.mxu3 %v609_v16  ;;  %v639_v21 = vand.u32 4294901760, %v638_v20 }
 0x122   : > { %640 = vmatpush.xpose.msra.mxu2 %v639_v21  ;;  %836 = vmatpush.msra.mxu1 %v3138_v55 }
 0x124   : > { %2721 = vmatpush.msk.msra.mxu3 %vm3123_vm3, %v2921_v56 }
 0x125   : > { %642 = vmatmul.f32.vlgmr.msra.gmra.mxu2 %v611_v10  ;;  %690 = vmatmul.f32.vlgmr.msrb.gmra.mxu1 %v613_v12 }
 0x126   : > { %712 = vmatpush.xpose.msrb.mxu2 %v637_v19  ;;  %2722 = vmatpush.msk.msrb.mxu1 %vm3123_vm3, %v2921_v56  ;;  %v1006_v19 = vand.u32 4294901760, %v985_v18 }
 0x127   : > { %736 = vmatmul.f32.vlgmr.msrb.gmra.mxu3 %v611_v10 }
 0x12a   : > { %859 = vmatpush.msra.mxu2 %v3130_v52 }
 0x12d   : > { %714 = vmatmul.f32.vlgmr.msrb.gmra.mxu2 %v611_v10 }
 0x19a   : > { %v617_v22 = vpop.f32.mrf.mxu1 }
 0x1a2   : > { %v667_v23 = vpop.f32.mrf.mxu3  ;;  %v691_v27 = vpop.f32.mrf.mxu1 }
 0x1a8   : > { %v643_v24 = vpop.f32.mrf.mxu2 }
 0x1a9   : > { %v644_v25 = vadd.f32 %v643_v24, %v617_v22  ;;  %v1007_v22 = vsub.f32 %v985_v18, %v1006_v19 }
 0x1aa   : > { %v737_v31 = vpop.f32.mrf.mxu3 }
 0x1ab   : > { %v668_v26 = vadd.f32 %v667_v23, %v644_v25  ;;  %v1008_v25 = vand.u32 4294901760, %v1007_v22 }
 0x1ad   : > { %v692_v28 = vadd.f32 %v691_v27, %v668_v26  ;;  %v1009_v27 = vsub.f32 %v1007_v22, %v1008_v25 }
 0x1b0   : > { %v715_v29 = vpop.f32.mrf.mxu2 }
 0x1b1   : > { %v716_v30 = vadd.f32 %v715_v29, %v692_v28 }
 0x1b3   : > { %v3108_v32 = vadd.f32 %v737_v31, %v716_v30 }
 0x1b5   : > { %v743_v33 = vsel %vm588_vm1, %v3108_v32, 0.0  ;;  %v740_v34 = vsel %vm588_vm1, %v3108_v32, -inf }
 0x1b6   : > { %744 = vadd.xlane.f32.xlu0 %v743_v33  ;;  %741 = vmax.xlane.f32.xlu1 %v740_v34  ;;  %v1010_v34 = vand.u32 4294901760, %v1009_v27 }
 0x229   : > { %v745_v42 = vpop.xlane.xlu0 %744  ;;  %v742_v44 = vpop.xlane.xlu1 %741 }
 0x22a   : > { %v753_v43 = vmul.f32 %v3114_v41, %v745_v42  ;;  %v944_v20 = vsub.f32 %v3108_v32, %v742_v44 }
 0x22c   : > { %v754_v45 = vsub.f32 %v742_v44, %v753_v43 }
 0x22e   : > { %755 = vxpose.xlu1.b32.start.end [1/1] (short) (narrow) %v754_v45, 8 }
 0x2d2   : > { %v771_v57 = vpop.trf.xlu1 }
 0x2d3   : > { %v788_v58 = vsel %vm588_vm1, %v771_v57, 0 }
 0x2d4   : > { %v807_v59 = vand.u32 4294901760, %v788_v58 }
 0x2d6   : > { %v808_v60 = vsub.f32 %v788_v58, %v807_v59  ;;  %838 = vmatmul.f32.vlgmr.msra.gmra.mxu1 %v807_v59 }
 0x2d8   : > { %v809_v61 = vand.u32 4294901760, %v808_v60  ;;  %862 = vmatmul.f32.vlgmr.msra.gmra.mxu2 %v808_v60 }
 0x2da   : > { %886 = vmatmul.f32.vlgmr.msra.gmra.mxu3 %v809_v61  ;;  %v810_v62 = vsub.f32 %v808_v60, %v809_v61 }
 0x2dc   : > { %v811_v63 = vand.u32 4294901760, %v810_v62 }
 0x2de   : > { %812 = vmatmul.f32.vlgmr.msrb.gmra.mxu0 %v811_v63  ;;  %932 = vmatmul.f32.vlgmr.msrb.gmra.mxu1 %v807_v59 }
 0x2e6   : > { %910 = vmatmul.f32.vlgmr.msra.gmra.mxu0 %v807_v59 }
 0x353   : > { %v839_v0 = vpop.f32.mrf.mxu1 }
 0x35b   : > { %v813_v1 = vpop.f32.mrf.mxu0  ;;  %v863_v3 = vpop.f32.mrf.mxu2 }
 0x35c   : > { %v840_v2 = vadd.f32 %v839_v0, %v813_v1  ;;  %v933_v12 = vpop.f32.mrf.mxu1 }
 0x35d   : > { %v887_v6 = vpop.f32.mrf.mxu3 }
 0x35e   : > { %v864_v5 = vadd.f32 %v863_v3, %v840_v2 }
 0x360   : > { %v888_v9 = vadd.f32 %v887_v6, %v864_v5 }
 0x363   : > { %v911_v10 = vpop.f32.mrf.mxu0 }
 0x364   : > { %v912_v11 = vadd.f32 %v911_v10, %v888_v9 }
 0x366   : > { %v934_v13 = vadd.f32 %v933_v12, %v912_v11 }
 0x368   : > { %v936_v14 = vperm.slane %v934_v13, 0 }
 0x36a   : > { %vm937_vm4 = vcmp.gt.f32.partialorder %v936_v14, %v754_v45 }
 0x36b   : > { %v2723_v15 = vsel %vm937_vm4, 1.0, %v2920_v50 }
 0x36c   : > { %v940_v16 = vsel %vm588_vm1, %v2723_v15, 0.0 }
 0x36d   : > { %941 = vadd.xlane.f32.xlu2 %v940_v16 }
 0x385   : > { %983 = vrot.lane.b32.xlu2 %v3098_v7, %s2922_s26 }
 0x3e0   : > { %v942_v21 = vpop.xlane.xlu2 %941 }
 0x3e1   : > { %vm943_vm5 = vcmp.lt.f32.partialorder %v942_v21, 1.5 }
 0x3e2   : > { %v947_v23 = vsel %vm943_vm5, %v944_v20, 0.0 }
 0x3e3   : > { %v948_v24 = vmul.f32 1.442695, %v947_v23 }
 0x3e5   : > { %2825 = vpow2.f32 %v948_v24 }
 0x3e8   : > { %v984_v26 = vpop.permute.xlu2 %983 }
 0x3e9   : > { %v987_v28 = vsel %vm588_vm1, %v984_v26, 0 }
 0x3ea   : > { %v1004_v29 = vand.u32 4294901760, %v987_v28 }
 0x3eb   : > { %v2826_v30 = vpop.eup %2825 }
 0x3ec   : > { %v1031_v31 = vsub.f32 %v987_v28, %v1004_v29  ;;  %1005 = vmatpush.xpose.msrb.mxu3 %v1004_v29  ;;  %v950_v33 = vsel %vm588_vm1, %v2826_v30, 0.0 }
 0x3ed   : > { %951 = vadd.xlane.f32.xlu2 %v950_v33 }
 0x3ee   : > { %v1032_v32 = vand.u32 4294901760, %v1031_v31  ;;  %1058 = vmatpush.xpose.msra.mxu1 %v1031_v31 }
 0x3ef   : > { %1011 = vmatmul.f32.vlgmr.msrb.gmra.mxu3 %v1010_v34 }
 0x3f0   : > { %v1033_v35 = vsub.f32 %v1031_v31, %v1032_v32  ;;  %1107 = vmatpush.xpose.msra.mxu3 %v1032_v32 }
 0x3f1   : > { %1061 = vmatmul.f32.vlgmr.msra.gmra.mxu1 %v1007_v22 }
 0x3f2   : > { %2725 = vmatpush.msk.msrb.mxu1 %vm3123_vm3, %v2921_v56  ;;  %v1034_v36 = vand.u32 4294901760, %v1033_v35 }
 0x3f4   : > { %1247 = vmatpush.msrb.mxu3 %v3130_v52  ;;  %1296 = vmatpush.msra.mxu1 %v3133_v53 }
 0x3f5   : > { %1035 = vmatpush.xpose.msrb.mxu0 %v1034_v36 }
 0x3f7   : > { %1109 = vmatmul.f32.vlgmr.msra.gmra.mxu3 %v1006_v19 }
 0x3f8   : > { %1037 = vmatmul.f32.vlgmr.msrb.gmra.mxu0 %v1006_v19 }
 0x3f9   : > { %1129 = vmatpush.xpose.msra.mxu0 %v1004_v29 }
 0x3fd   : > { %2726 = vmatpush.msk.msrb.mxu0 %vm3123_vm3, %v2921_v56 }
 0x400   : > { %1131 = vmatmul.f32.vlgmr.msra.gmra.mxu0 %v1006_v19 }
 0x405   : > { %955 = vrot.lane.b32.xlu2 %v3098_v7, %s2923_s27 }
 0x460   : > { %v952_v37 = vpop.xlane.xlu2 %951 }
 0x461   : > { %2827 = vrcp.f32 %v952_v37 }
 0x467   : > { %v2828_v38 = vpop.eup %2827 }
 0x468   : > { %v954_v39 = vmul.f32 %v2828_v38, %v2826_v30  ;;  %v956_v40 = vpop.permute.xlu2 %955 }
 0x469   : > { %976 = vmatpush.msrb.mxu2 %v956_v40 }
 0x46a   : > { %2724 = vmatmul.msk.f32.vlgmr.msrb.gmra.mxu2 %vm588_vm1, %v954_v39 }
 0x46b   : > { %1081 = vmatpush.xpose.msra.mxu2 %v1004_v29 }
 0x46e   : > { %v1062_v46 = vpop.f32.mrf.mxu1 }
 0x46f   : > { %1224 = vmatpush.msrb.mxu2 %v3138_v55 }
 0x472   : > { %1085 = vmatmul.f32.vlgmr.msra.gmra.mxu2 %v1008_v25  ;;  %v1012_v42 = vpop.f32.mrf.mxu3 }
 0x473   : > { %2727 = vmatpush.msk.msra.mxu2 %vm3123_vm3, %v2921_v56 }
 0x475   : > { %v1038_v43 = vpop.f32.mrf.mxu0 }
 0x476   : > { %v1039_v45 = vadd.f32 %v1038_v43, %v1012_v42 }
 0x478   : > { %v1063_v51 = vadd.f32 %v1062_v46, %v1039_v45 }
 0x47a   : > { %v1110_v58 = vpop.f32.mrf.mxu3 }
 0x47d   : > { %v1132_v60 = vpop.f32.mrf.mxu0 }
 0x4ed   : > { %v3174_v44 = vpop.f32.mrf.mxu2 }
 0x4f5   : > { %v1086_v54 = vpop.f32.mrf.mxu2 }
 0x4f6   : > { %v1087_v57 = vadd.f32 %v1086_v54, %v1063_v51 }
 0x4f8   : > { %v1111_v59 = vadd.f32 %v1110_v58, %v1087_v57 }
 0x4fa   : > { %v3176_v61 = vadd.f32 %v1132_v60, %v1111_v59 }
 0x4fc   : > { %v1138_v62 = vsel %vm588_vm1, %v3176_v61, 0.0  ;;  %v1135_v63 = vsel %vm588_vm1, %v3176_v61, -inf }
 0x4fd   : > { %1139 = vadd.xlane.f32.xlu0 %v1138_v62  ;;  %1136 = vmax.xlane.f32.xlu2 %v1135_v63 }
 0x515   : > { %1369 = vrot.lane.b32.xlu2 %v3102_v8, %s2924_s20 }
 0x570   : > { %v1140_v0 = vpop.xlane.xlu0 %1139  ;;  %v3184_v2 = vpop.xlane.xlu2 %1136 }
 0x571   : > { %v1141_v1 = vmul.f32 %v1140_v0, %v3114_v41  ;;  %v1332_v43 = vsub.f32 %v3176_v61, %v3184_v2 }
 0x573   : > { %v1142_v3 = vsub.f32 %v3184_v2, %v1141_v1 }
 0x575   : > { %1143 = vxpose.xlu0.b32.start.end [1/1] (short) (narrow) %v1142_v3, 8 }
 0x578   : > { %v1370_v14 = vpop.permute.xlu2 %1369 }
 0x579   : > { %v1373_v15 = vsel %vm588_vm1, %v1370_v14, 0 }
 0x57a   : > { %v1394_v16 = vand.u32 4294901760, %v1373_v15 }
 0x57c   : > { %v1395_v17 = vsub.f32 %v1373_v15, %v1394_v16 }
 0x57e   : > { %v1396_v18 = vand.u32 4294901760, %v1395_v17 }
 0x580   : > { %v1397_v20 = vsub.f32 %v1395_v17, %v1396_v18 }
 0x582   : > { %v1398_v24 = vand.u32 4294901760, %v1397_v20 }
 0x5e3   : > { %1371 = vrot.lane.b32.xlu0 %v3098_v7, %s2925_s18  ;;  %s537_s18 = sand.u32 1, %s2907_s25  }
 0x619   : > { %v1159_v5 = vpop.trf.xlu0 }
 0x61a   : > { %v1176_v6 = vsel %vm588_vm1, %v1159_v5, 0 }
 0x61b   : > { %v1195_v9 = vand.u32 4294901760, %v1176_v6 }
 0x61d   : > { %v1196_v10 = vsub.f32 %v1176_v6, %v1195_v9  ;;  %1226 = vmatmul.f32.vlgmr.msrb.gmra.mxu2 %v1195_v9 }
 0x61f   : > { %v1197_v11 = vand.u32 4294901760, %v1196_v10  ;;  %1250 = vmatmul.f32.vlgmr.msrb.gmra.mxu3 %v1196_v10 }
 0x621   : > { %v1198_v12 = vsub.f32 %v1196_v10, %v1197_v11  ;;  %1274 = vmatmul.f32.vlgmr.msrb.gmra.mxu0 %v1197_v11 }
 0x623   : > { %v1199_v13 = vand.u32 4294901760, %v1198_v12 }
 0x625   : > { %1200 = vmatmul.f32.vlgmr.msrb.gmra.mxu1 %v1199_v13  ;;  %1320 = vmatmul.f32.vlgmr.msra.gmra.mxu2 %v1195_v9 }
 0x62d   : > { %1298 = vmatmul.f32.vlgmr.msra.gmra.mxu1 %v1195_v9 }
 0x655   : > { %v1372_v19 = vpop.permute.xlu0 %1371 }
 0x656   : > { %v1375_v21 = vsel %vm588_vm1, %v1372_v19, 0 }
 0x657   : > { %v1392_v22 = vand.u32 4294901760, %v1375_v21 }
 0x659   : > { %v1419_v23 = vsub.f32 %v1375_v21, %v1392_v22  ;;  %1393 = vmatpush.xpose.msra.mxu0 %v1392_v22 }
 0x65b   : > { %v1420_v25 = vand.u32 4294901760, %v1419_v23  ;;  %1446 = vmatpush.xpose.msrb.mxu2 %v1419_v23 }
 0x65c   : > { %1399 = vmatmul.f32.vlgmr.msra.gmra.mxu0 %v1398_v24 }
 0x65d   : > { %v1421_v26 = vsub.f32 %v1419_v23, %v1420_v25  ;;  %1495 = vmatpush.xpose.msrb.mxu0 %v1420_v25 }
 0x65e   : > { %1449 = vmatmul.f32.vlgmr.msrb.gmra.mxu2 %v1395_v17 }
 0x65f   : > { %2730 = vmatpush.msk.msra.mxu2 %vm3123_vm3, %v2921_v56  ;;  %v1422_v27 = vand.u32 4294901760, %v1421_v26 }
 0x661   : > { %1635 = vmatpush.msra.mxu0 %v3130_v52  ;;  %1684 = vmatpush.msrb.mxu2 %v3133_v53 }
 0x662   : > { %1423 = vmatpush.xpose.msrb.mxu1 %v1422_v27 }
 0x664   : > { %1497 = vmatmul.f32.vlgmr.msrb.gmra.mxu0 %v1394_v16 }
 0x665   : > { %1425 = vmatmul.f32.vlgmr.msrb.gmra.mxu1 %v1394_v16 }
 0x666   : > { %1517 = vmatpush.xpose.msra.mxu1 %v1392_v22 }
 0x66a   : > { %2731 = vmatpush.msk.msrb.mxu1 %vm3123_vm3, %v2921_v56 }
 0x66d   : > { %1519 = vmatmul.f32.vlgmr.msra.gmra.mxu1 %v1394_v16 }
 0x69e   : > { %v1275_v34 = vpop.f32.mrf.mxu0 }
 0x6a0   : > { %v1227_v28 = vpop.f32.mrf.mxu2 }
 0x6a2   : > { %v1201_v29 = vpop.f32.mrf.mxu1  ;;  %v1251_v31 = vpop.f32.mrf.mxu3 }
 0x6a3   : > { %v1228_v30 = vadd.f32 %v1227_v28, %v1201_v29 }
 0x6a5   : > { %v1252_v33 = vadd.f32 %v1251_v31, %v1228_v30 }
 0x6a7   : > { %v1276_v32 = vadd.f32 %v1275_v34, %v1252_v33 }
 0x6a8   : > { %v1321_v37 = vpop.f32.mrf.mxu2 }
 0x6aa   : > { %v1299_v35 = vpop.f32.mrf.mxu1 }
 0x6ab   : > { %v1300_v36 = vadd.f32 %v1299_v35, %v1276_v32 }
 0x6ad   : > { %v1322_v38 = vadd.f32 %v1321_v37, %v1300_v36 }
 0x6af   : > { %v1324_v39 = vperm.slane %v1322_v38, 0 }
 0x6b1   : > { %vm1325_vm6 = vcmp.gt.f32.partialorder %v1324_v39, %v1142_v3 }
 0x6b2   : > { %v2728_v40 = vsel %vm1325_vm6, 1.0, %v2920_v50 }
 0x6b3   : > { %v1328_v42 = vsel %vm588_vm1, %v2728_v40, 0.0 }
 0x6b4   : > { %1329 = vadd.xlane.f32.xlu1 %v1328_v42 }
 0x6d9   : > { %v1400_v61 = vpop.f32.mrf.mxu0 }
 0x6e1   : > { %v1450_v2 = vpop.f32.mrf.mxu2  ;;  %v1498_v9 = vpop.f32.mrf.mxu0 }
 0x6e2   : > { %v1426_v63 = vpop.f32.mrf.mxu1 }
 0x6e3   : > { %v1427_v1 = vadd.f32 %v1426_v63, %v1400_v61 }
 0x6e5   : > { %v1451_v3 = vadd.f32 %v1450_v2, %v1427_v1 }
 0x6ea   : > { %v1520_v11 = vpop.f32.mrf.mxu1 }
 0x727   : > { %v1330_v45 = vpop.xlane.xlu1 %1329 }
 0x728   : > { %vm1331_vm7 = vcmp.lt.f32.partialorder %v1330_v45, 1.5 }
 0x729   : > { %v1335_v46 = vsel %vm1331_vm7, %v1332_v43, 0.0 }
 0x72a   : > { %v1336_v51 = vmul.f32 1.442695, %v1335_v46 }
 0x72c   : > { %2829 = vpow2.f32 %v1336_v51 }
 0x732   : > { %v2830_v54 = vpop.eup %2829 }
 0x733   : > { %v1338_v57 = vsel %vm588_vm1, %v2830_v54, 0.0 }
 0x734   : > { %1339 = vadd.xlane.f32.xlu2 %v1338_v57 }
 0x74c   : > { %1343 = vrot.lane.b32.xlu2 %v3098_v7, %s2926_s21  ;;  %s2716_s21 = sshll.u32 %s537_s18, 2 }
 0x74d   : > { %s539_s20 = scalar_lea.vmem [#allocation2], %s2716_s21  ;;  %s2873_s21 = scalar_lea.hbm %s3445_s17, 8 }
 0x7a7   : > { %v1340_v58 = vpop.xlane.xlu2 %1339 }
 0x7a8   : > { %2831 = vrcp.f32 %v1340_v58 }
 0x7ae   : > { %v2832_v59 = vpop.eup %2831 }
 0x7af   : > { %v1342_v60 = vmul.f32 %v2832_v59, %v2830_v54  ;;  %v1344_v62 = vpop.permute.xlu2 %1343 }
 0x7b0   : > { %1364 = vmatpush.msra.mxu3 %v1344_v62 }
 0x7b1   : > { %2729 = vmatmul.msk.f32.vlgmr.msra.gmra.mxu3 %vm588_vm1, %v1342_v60 }
 0x7b2   : > { %1469 = vmatpush.xpose.msrb.mxu3 %v1392_v22 }
 0x7b6   : > { %1612 = vmatpush.msra.mxu3 %v3138_v55 }
 0x7b9   : > { %1473 = vmatmul.f32.vlgmr.msrb.gmra.mxu3 %v1396_v18 }
 0x7ba   : > { %2732 = vmatpush.msk.msrb.mxu3 %vm3123_vm3, %v2921_v56 }
 0x834   : > { %v3210_v0 = vpop.f32.mrf.mxu3 }
 0x83c   : > { %v1474_v5 = vpop.f32.mrf.mxu3 }
 0x83d   : > { %v1475_v6 = vadd.f32 %v1474_v5, %v1451_v3 }
 0x83f   : > { %v1499_v10 = vadd.f32 %v1498_v9, %v1475_v6 }
 0x841   : > { %v1521_v12 = vadd.f32 %v1520_v11, %v1499_v10 }
 0x843   : > { %v1526_v13 = vsel %vm588_vm1, %v1521_v12, 0.0  ;;  %v1523_v14 = vsel %vm588_vm1, %v1521_v12, -inf }
 0x844   : > { %1527 = vadd.xlane.f32.xlu2 %v1526_v13  ;;  %1524 = vmax.xlane.f32.xlu1 %v1523_v14 }
 0x8b7   : > { %v1528_v15 = vpop.xlane.xlu2 %1527  ;;  %v1525_v17 = vpop.xlane.xlu1 %1524 }
 0x8b8   : > { %v1529_v16 = vmul.f32 %v1528_v15, %v3114_v41  ;;  %v1720_v40 = vsub.f32 %v1521_v12, %v1525_v17 }
 0x8ba   : > { %v1530_v18 = vsub.f32 %v1525_v17, %v1529_v16 }
 0x8bc   : > { %1531 = vxpose.xlu1.b32.start.end [1/1] (short) (narrow) %v1530_v18, 8 }
 0x960   : > { %v1547_v19 = vpop.trf.xlu1 }
 0x961   : > { %v1564_v20 = vsel %vm588_vm1, %v1547_v19, 0 }
 0x962   : > { %v1583_v21 = vand.u32 4294901760, %v1564_v20 }
 0x964   : > { %v1584_v22 = vsub.f32 %v1564_v20, %v1583_v21  ;;  %1614 = vmatmul.f32.vlgmr.msra.gmra.mxu3 %v1583_v21 }
 0x966   : > { %v1585_v23 = vand.u32 4294901760, %v1584_v22  ;;  %1638 = vmatmul.f32.vlgmr.msra.gmra.mxu0 %v1584_v22 }
 0x968   : > { %v1586_v24 = vsub.f32 %v1584_v22, %v1585_v23  ;;  %1662 = vmatmul.f32.vlgmr.msrb.gmra.mxu1 %v1585_v23 }
 0x96a   : > { %v1587_v25 = vand.u32 4294901760, %v1586_v24 }
 0x96c   : > { %1588 = vmatmul.f32.vlgmr.msra.gmra.mxu2 %v1587_v25  ;;  %1708 = vmatmul.f32.vlgmr.msrb.gmra.mxu3 %v1583_v21 }
 0x974   : > { %1686 = vmatmul.f32.vlgmr.msrb.gmra.mxu2 %v1583_v21 }
 0x9e3   : > { %v1639_v29 = vpop.f32.mrf.mxu0 }
 0x9e5   : > { %v1663_v31 = vpop.f32.mrf.mxu1 }
 0x9e7   : > { %v1615_v26 = vpop.f32.mrf.mxu3 }
 0x9ef   : > { %v1589_v27 = vpop.f32.mrf.mxu2  ;;  %v1709_v35 = vpop.f32.mrf.mxu3 }
 0x9f0   : > { %v1616_v28 = vadd.f32 %v1615_v26, %v1589_v27 }
 0x9f2   : > { %v1640_v30 = vadd.f32 %v1639_v29, %v1616_v28 }
 0x9f4   : > { %v1664_v33 = vadd.f32 %v1663_v31, %v1640_v30 }
 0x9f7   : > { %v1687_v34 = vpop.f32.mrf.mxu2 }
 0x9f8   : > { %v1688_v32 = vadd.f32 %v1687_v34, %v1664_v33 }
 0x9fa   : > { %v1710_v36 = vadd.f32 %v1709_v35, %v1688_v32 }
 0x9fc   : > { %v1712_v37 = vperm.slane %v1710_v36, 0 }
 0x9fe   : > { %vm1713_vm8 = vcmp.gt.f32.partialorder %v1712_v37, %v1530_v18 }
 0x9ff   : > { %v2733_v38 = vsel %vm1713_vm8, 1.0, %v2920_v50  ;;  %vm2320_vm8 = vcmask 523264  }
 0xa00   : > { %v1716_v39 = vsel %vm588_vm1, %v2733_v38, 0.0 }
 0xa01   : > { %1717 = vadd.xlane.f32.xlu2 %v1716_v39 }
 0xa19   : > { %1759 = vrot.lane.b32.xlu2 %v3098_v7, %s2927_s22  ;;  %s2751_s22 = sshll.u32 %s3047_s28, 2  ;;  %s2650_s28 = sshll.u32 %s539_s20, 4  ;;  %s2651_s28 = int_to_ptr.vmem [resolvable:$true] %s2650_s28 }
 0xa21   : > { %1757 = vrot.lane.b32.xlu2 %v3102_v8, %s2928_s29  ;;  %s2638_s29 = scalar_lea.sflag [#allocation3], %s537_s18 }
 0xa29   : > { %1731 = vrot.lane.b32.xlu2 %v3098_v7, %s2929_s19  ;;  %s2933_s19 = smov 24  }
 0xa74   : > { %v1718_v42 = vpop.xlane.xlu2 %1717 }
 0xa75   : > { %vm1719_vm9 = vcmp.lt.f32.partialorder %v1718_v42, 1.5 }
 0xa76   : > { %v1723_v43 = vsel %vm1719_vm9, %v1720_v40, 0.0 }
 0xa77   : > { %v1724_v45 = vmul.f32 1.442695, %v1723_v43 }
 0xa79   : > { %2833 = vpow2.f32 %v1724_v45 }
 0xa7c   : > { %v1760_v46 = vpop.permute.xlu2 %1759 }
 0xa7d   : > { %v1763_v51 = vsel %vm588_vm1, %v1760_v46, 0 }
 0xa7e   : > { %v1780_v54 = vand.u32 4294901760, %v1763_v51 }
 0xa7f   : > { %v2834_v57 = vpop.eup %2833 }
 0xa80   : > { %v1807_v58 = vsub.f32 %v1763_v51, %v1780_v54  ;;  %1781 = vmatpush.xpose.msra.mxu1 %v1780_v54  ;;  %v1726_v59 = vsel %vm588_vm1, %v2834_v57, 0.0 }
 0xa81   : > { %1727 = vadd.xlane.f32.xlu0 %v1726_v59 }
 0xa82   : > { %v1808_v8 = vand.u32 4294901760, %v1807_v58  ;;  %1834 = vmatpush.xpose.msra.mxu3 %v1807_v58 }
 0xa84   : > { %v1809_v60 = vsub.f32 %v1807_v58, %v1808_v8  ;;  %1883 = vmatpush.xpose.msrb.mxu1 %v1808_v8  ;;  %v1758_v62 = vpop.permute.xlu2 %1757 }
 0xa85   : > { %v1761_v61 = vsel %vm588_vm1, %v1758_v62, 0 }
 0xa86   : > { %2735 = vmatpush.msk.msrb.mxu3 %vm3123_vm3, %v2921_v56  ;;  %v1810_v63 = vand.u32 4294901760, %v1809_v60  ;;  %v1782_v1 = vand.u32 4294901760, %v1761_v61 }
 0xa88   : > { %v1783_v2 = vsub.f32 %v1761_v61, %v1782_v1  ;;  %1811 = vmatpush.xpose.msra.mxu2 %v1810_v63 }
 0xa8a   : > { %v1784_v3 = vand.u32 4294901760, %v1783_v2  ;;  %1837 = vmatmul.f32.vlgmr.msra.gmra.mxu3 %v1783_v2 }
 0xa8b   : > { %1813 = vmatmul.f32.vlgmr.msra.gmra.mxu2 %v1782_v1  ;;  %2072 = vmatpush.msra.mxu3 %v3133_v53 }
 0xa8c   : > { %1905 = vmatpush.xpose.msrb.mxu2 %v1780_v54  ;;  %v1785_v5 = vsub.f32 %v1783_v2, %v1784_v3  ;;  %v1732_v6 = vpop.permute.xlu2 %1731  ;;  %v2164_v2 = vld [vmem:[%s3470_s3 + $0x10] sm:$0xff] }
 0xa8d   : > { %1752 = vmatpush.msrb.mxu0 %v1732_v6 }
 0xa8e   : > { %v1786_v9 = vand.u32 4294901760, %v1785_v5  ;;  %v2162_v5 = vld [vmem:[%s3470_s3] sm:$0xff] }
 0xa8f   : > { %1857 = vmatpush.xpose.msra.mxu0 %v1780_v54 }
 0xa90   : > { %2736 = vmatpush.msk.msra.mxu2 %vm3123_vm3, %v2921_v56  ;;  %1787 = vmatmul.f32.vlgmr.msra.gmra.mxu1 %v1786_v9 }
 0xa91   : > { %2023 = vmatpush.msra.mxu1 %v3130_v52 }
 0xa93   : > { %1907 = vmatmul.f32.vlgmr.msrb.gmra.mxu2 %v1782_v1 }
 0xa98   : > { %1885 = vmatmul.f32.vlgmr.msrb.gmra.mxu1 %v1782_v1  ;;  %v2165_v1 = vld [vmem:[%s3470_s3 + $0x18] sm:$0xff] }
 0xa99   : > { %2185 = vmatpush.msrb.mxu2 %v2165_v1 }
 0xa9b   : > { %2186 = vmatpush.msrb.mxu2 %v2164_v2  ;;  %v2312_v2 = vld [vmem:[%s3437_s9 + $0x20] sm:$0xff] }
 0xaf4   : > { %v1728_v10 = vpop.xlane.xlu0 %1727 }
 0xaf5   : > { %2835 = vrcp.f32 %v1728_v10 }
 0xafb   : > { %v2836_v11 = vpop.eup %2835 }
 0xafc   : > { %v1730_v12 = vmul.f32 %v2836_v11, %v2834_v57 }
 0xafe   : > { %2734 = vmatmul.msk.f32.vlgmr.msrb.gmra.mxu0 %vm588_vm1, %v1730_v12 }
 0xaff   : > { %2000 = vmatpush.msrb.mxu0 %v3138_v55 }
 0xb06   : > { %1861 = vmatmul.f32.vlgmr.msra.gmra.mxu0 %v1784_v3 }
 0xb07   : > { %2737 = vmatpush.msk.msra.mxu0 %vm3123_vm3, %v2921_v56 }
 0xb0d   : > { %v1788_v53 = vpop.f32.mrf.mxu1  ;;  %v1838_v52 = vpop.f32.mrf.mxu3 }
 0xb0e   : > { %v1814_v13 = vpop.f32.mrf.mxu2 }
 0xb0f   : > { %v1815_v15 = vadd.f32 %v1814_v13, %v1788_v53  ;;  %v2813_v13 = vld [vmem:[%s3432_s4] ss:$0 sm:$0xff] }
 0xb11   : > { %v1839_v16 = vadd.f32 %v1838_v52, %v1815_v15 }
 0xb15   : > { %v1886_v19 = vpop.f32.mrf.mxu1 }
 0xb16   : > { %v1908_v21 = vpop.f32.mrf.mxu2 }
 0xb7b   : > { %v1754_v14 = vpop.f32.mrf.mxu0 }
 0xb83   : > { %v1862_v17 = vpop.f32.mrf.mxu0 }
 0xb84   : > { %v1863_v18 = vadd.f32 %v1862_v17, %v1839_v16  ;;  %v2934_v17 = vmov 32.0  }
 0xb86   : > { %v1887_v20 = vadd.f32 %v1886_v19, %v1863_v18 }
 0xb88   : > { %v1909_v22 = vadd.f32 %v1908_v21, %v1887_v20 }
 0xb8a   : > { %v1914_v23 = vsel %vm588_vm1, %v1909_v22, 0.0  ;;  %v1911_v55 = vsel %vm588_vm1, %v1909_v22, -inf }
 0xb8b   : > { %1915 = vadd.xlane.f32.xlu2 %v1914_v23  ;;  %1912 = vmax.xlane.f32.xlu1 %v1911_v55 }
 0xbfe   : > { %v1916_v49 = vpop.xlane.xlu2 %1915  ;;  %v1913_v24 = vpop.xlane.xlu1 %1912 }
 0xbff   : > { %v1917_v56 = vmul.f32 %v1916_v49, %v3114_v41  ;;  %v2108_v51 = vsub.f32 %v1909_v22, %v1913_v24 }
 0xc01   : > { %v1918_v25 = vsub.f32 %v1913_v24, %v1917_v56  ;;  %v2236_v24 = vld [vmem:[%s3435_s7 + $0x18] sm:$0xff] }
 0xc03   : > { %1919 = vxpose.xlu0.b32.start.end [1/1] (short) (narrow) %v1918_v25, 8 }
 0xc71   : > { %2146 = vrot.lane.b32.xlu0 %v3210_v0, %s2930_s30  ;;  %s2935_s30 = smov 32  }
 0xca7   : > { %v1935_v26 = vpop.trf.xlu0 }
 0xca8   : > { %v1952_v27 = vsel %vm588_vm1, %v1935_v26, 0  ;;  %v2234_v26 = vld [vmem:[%s3435_s7 + $0x8] sm:$0xff] }
 0xca9   : > { %v1971_v28 = vand.u32 4294901760, %v1952_v27 }
 0xcab   : > { %v1972_v29 = vsub.f32 %v1952_v27, %v1971_v28  ;;  %2002 = vmatmul.f32.vlgmr.msrb.gmra.mxu0 %v1971_v28  ;;  %v2233_v27 = vld [vmem:[%s3435_s7] sm:$0xff] }
 0xcad   : > { %v1973_v30 = vand.u32 4294901760, %v1972_v29  ;;  %2026 = vmatmul.f32.vlgmr.msra.gmra.mxu1 %v1972_v29 }
 0xcaf   : > { %v1974_v31 = vsub.f32 %v1972_v29, %v1973_v30  ;;  %2050 = vmatmul.f32.vlgmr.msra.gmra.mxu2 %v1973_v30 }
 0xcb1   : > { %v1975_v33 = vand.u32 4294901760, %v1974_v31 }
 0xcb3   : > { %1976 = vmatmul.f32.vlgmr.msrb.gmra.mxu3 %v1975_v33  ;;  %2096 = vmatmul.f32.vlgmr.msra.gmra.mxu0 %v1971_v28 }
 0xcb4   : > { %2256 = vmatpush.msrb.mxu3 %v2236_v24 }
 0xcbb   : > { %2074 = vmatmul.f32.vlgmr.msra.gmra.mxu3 %v1971_v28 }
 0xce3   : > { %v2147_v9 = vpop.permute.xlu0 %2146 }
 0xce4   : > { %v2157_v10 = vsel %vm588_vm1, %v3174_v44, %v2147_v9  ;;  %v2310_v9 = vld [vmem:[%s3437_s9 + $0x10] sm:$0xff] }
 0xd28   : > { %v2003_v41 = vpop.f32.mrf.mxu0 }
 0xd2a   : > { %v2027_v35 = vpop.f32.mrf.mxu1 }
 0xd30   : > { %v2097_v40 = vpop.f32.mrf.mxu0 }
 0xd32   : > { %v2051_v0 = vpop.f32.mrf.mxu2 }
 0xd36   : > { %v1977_v34 = vpop.f32.mrf.mxu3 }
 0xd37   : > { %v2004_v32 = vadd.f32 %v2003_v41, %v1977_v34 }
 0xd39   : > { %v2028_v36 = vadd.f32 %v2027_v35, %v2004_v32 }
 0xd3b   : > { %v2052_v37 = vadd.f32 %v2051_v0, %v2028_v36  ;;  %v2814_v36 = vld [vmem:[%s3433_s5] ss:$0 sm:$0xff] }
 0xd3e   : > { %v2075_v38 = vpop.f32.mrf.mxu3 }
 0xd3f   : > { %v2076_v39 = vadd.f32 %v2075_v38, %v2052_v37  ;;  %v2815_v38 = vld [vmem:[%s3434_s6] ss:$0 sm:$0xff] }
 0xd41   : > { %v2098_v42 = vadd.f32 %v2097_v40, %v2076_v39 }
 0xd43   : > { %v2100_v43 = vperm.slane %v2098_v42, 0  ;;  %v2816_v42 = vld [vmem:[%s3436_s8] ss:$0 sm:$0xff] }
 0xd45   : > { %vm2101_vm10 = vcmp.gt.f32.partialorder %v2100_v43, %v1918_v25  ;;  %v2235_v25 = vld [vmem:[%s3435_s7 + $0x10] sm:$0xff] }
 0xd46   : > { %v2738_v45 = vsel %vm2101_vm10, 1.0, %v2920_v50  ;;  %2257 = vmatpush.msrb.mxu3 %v2235_v25 }
 0xd47   : > { %v2104_v46 = vsel %vm588_vm1, %v2738_v45, 0.0 }
 0xd48   : > { %2105 = vadd.xlane.f32.xlu2 %v2104_v46  ;;  %2258 = vmatpush.msrb.mxu3 %v2234_v26 }
 0xd4a   : > { %2259 = vmatpush.msrb.mxu3 %v2233_v27 }
 0xdbb   : > { %v2106_v54 = vpop.xlane.xlu2 %2105 }
 0xdbc   : > { %vm2107_vm11 = vcmp.lt.f32.partialorder %v2106_v54, 1.5 }
 0xdbd   : > { %v2111_v57 = vsel %vm2107_vm11, %v2108_v51, 0.0 }
 0xdbe   : > { %v2112_v58 = vmul.f32 1.442695, %v2111_v57  ;;  %v2315_v57 = vld [vmem:[%s3437_s9 + $0x38] sm:$0xff] }
 0xdbf   : > { %2332 = vmatpush.msrb.mxu0 %v2315_v57 }
 0xdc0   : > { %2837 = vpow2.f32 %v2112_v58 }
 0xdc6   : > { %v2838_v59 = vpop.eup %2837 }
 0xdc7   : > { %v2114_v8 = vsel %vm588_vm1, %v2838_v59, 0.0 }
 0xdc8   : > { %2115 = vadd.xlane.f32.xlu2 %v2114_v8  ;;  %v2314_v8 = vld [vmem:[%s3437_s9 + $0x30] sm:$0xff] }
 0xdc9   : > { %2333 = vmatpush.msrb.mxu0 %v2314_v8  ;;  %v2818_v8 = vld [vmem:[%s3439_s11] ss:$0 sm:$0xff] }
 0xde0   : > { %2119 = vrot.lane.b32.xlu2 %v3098_v7, %s2931_s0  ;;  %v2163_v7 = vld [vmem:[%s3470_s3 + $0x8] sm:$0xff]  ;;  %s2648_s0 = scalar_lea.hbm %s3445_s17, %s2751_s22 }
 0xde1   : > { %2187 = vmatpush.msrb.mxu2 %v2163_v7  ;;  %s2652_s2 = sshll.u32 %s2648_s0, 4  ;;  %s2653_s2 = int_to_ptr.hbm [resolvable:$true] %s2652_s2 }
 0xde3   : > { %2188 = vmatpush.msrb.mxu2 %v2162_v5 }
 0xde8   : > { %2150 = vrot.lane.b32.xlu2 %v1754_v14, %s2932_s24 }
 0xe3b   : > { %v2116_v60 = vpop.xlane.xlu2 %2115 }
 0xe3c   : > { %2839 = vrcp.f32 %v2116_v60 }
 0xe3d   : > { %2841 = vrcp.f32 %v2934_v17 }
 0xe42   : > { %v2840_v62 = vpop.eup %2839 }
 0xe43   : > { %v2118_v61 = vmul.f32 %v2840_v62, %v2838_v59  ;;  %v2120_v63 = vpop.permute.xlu2 %2119  ;;  %v2842_v18 = vpop.eup %2841 }
 0xe44   : > { %2140 = vmatpush.msrb.mxu1 %v2120_v63  ;;  %v2200_v44 = vmul.f32 32.0, %v2842_v18  ;;  %vm2204_vm14 = vweird.f32 %v2842_v18 }
 0xe45   : > { %2739 = vmatmul.msk.f32.vlgmr.msrb.gmra.mxu1 %vm588_vm1, %v2118_v61  ;;  %v2313_v61 = vld [vmem:[%s3437_s9 + $0x28] sm:$0xff] }
 0xe46   : > { %v2201_v19 = vsub.f32 1.0, %v2200_v44  ;;  %2334 = vmatpush.msrb.mxu0 %v2313_v61  ;;  %v2819_v61 = vld [vmem:[%s3440_s12] ss:$0 sm:$0xff] }
 0xe48   : > { %v2202_v20 = vmul.f32 %v2842_v18, %v2201_v19  ;;  %2335 = vmatpush.msrb.mxu0 %v2312_v2 }
 0xe4a   : > { %v2203_v21 = vadd.f32 %v2842_v18, %v2202_v20 }
 0xe4b   : > { %v2151_v6 = vpop.permute.xlu2 %2150 }
 0xe4c   : > { %v2159_v11 = vsel %vm2158_vm12, %v2157_v10, %v2151_v6  ;;  %v3267_v22 = vsel %vm2204_vm14, %v2842_v18, %v2203_v21  ;;  %vm2411_vm12 = vcmask 785408   ;;  %vm2384_vm14 = vcmask 1046528  }
 0xec2   : > { %v2142_v3 = vpop.f32.mrf.mxu1 }
 0xec3   : > { %2154 = vrot.lane.b32.xlu2 %v2142_v3, %s2933_s19  ;;  %v2311_v3 = vld [vmem:[%s3437_s9 + $0x18] sm:$0xff] }
 0xec4   : > { %2336 = vmatpush.msrb.mxu0 %v2311_v3  ;;  %v2405_v3 = vld [vmem:[%s3441_s13 + $0x50] sm:$0xff] }
 0xec6   : > { %2337 = vmatpush.msrb.mxu0 %v2310_v9  ;;  %v2402_v9 = vld [vmem:[%s3441_s13 + $0x38] sm:$0xff] }
 0xf1d   : > { %v2155_v12 = vpop.permute.xlu2 %2154 }
 0xf1e   : > { %v2161_v53 = vsel %vm2160_vm13, %v2159_v11, %v2155_v12  ;;  %v2309_v11 = vld [vmem:[%s3437_s9 + $0x8] sm:$0xff] }
 0xf1f   : > { %2740 = vmatmul.msk.f32.vlgmr.msrb.gmra.mxu2 %vm553_vm0, %v2161_v53  ;;  %2338 = vmatpush.msrb.mxu0 %v2309_v11  ;;  %v2308_v53 = vld [vmem:[%s3437_s9] sm:$0xff]  ;;  %v2400_v11 = vld [vmem:[%s3441_s13 + $0x28] sm:$0xff] }
 0xf21   : > { %2339 = vmatpush.msrb.mxu0 %v2308_v53  ;;  %v2398_v53 = vld [vmem:[%s3441_s13 + $0x18] sm:$0xff] }
 0xfa2   : > { %v2190_v14 = vpop.f32.mrf.mxu2 }
 0xfa3   : > { %v2191_v15 = vadd.f32 %v2813_v13, %v2190_v14 }
 0xfa5   : > { %v2193_v52 = vadd.f32 %v2191_v15, %v3091_v4 }
 0xfa7   : > { %v2196_v16 = vsel %vm553_vm0, %v2193_v52, 0.0 }
 0xfa8   : > { %2197 = vadd.xlane.f32.xlu2 %v2196_v16 }
0x101b   : > { %v2198_v23 = vpop.xlane.xlu2 %2197 }
0x101c   : > { %v2206_v55 = vmul.f32 %v3267_v22, %v2198_v23 }
0x101e   : > { %v2207_v49 = vsub.f32 %v2193_v52, %v2206_v55 }
0x1020   : > { %v2208_v56 = vmul.f32 %v2207_v49, %v2207_v49 }
0x1022   : > { %v2209_v4 = vsel %vm553_vm0, %v2208_v56, 0.0 }
0x1023   : > { %2210 = vadd.xlane.f32.xlu1 %v2209_v4 }
0x1096   : > { %v2211_v28 = vpop.xlane.xlu1 %2210 }
0x1097   : > { %v2212_v29 = vmul.f32 %v2211_v28, %v3267_v22 }
0x1099   : > { %v2213_v30 = vadd.f32 1e-05, %v2212_v29 }
0x109b   : > { %2843 = vrsqrt.f32 %v2213_v30  ;;  %vm2220_vm2 = vweird.f32 %v2213_v30 }
0x10a1   : > { %v2844_v31 = vpop.eup %2843 }
0x10a2   : > { %v2215_v33 = vmul.f32 %v2844_v31, %v2213_v30  ;;  %vm2221_vm15 = vweird.f32 %v2844_v31 }
0x10a3   : > { %vm2222_vm3 = vmor %vm2220_vm2, %vm2221_vm15  ;;  %vm2605_vm15 = vcmask 257024  }
0x10a4   : > { %v2216_v41 = vmul.f32 %v2844_v31, %v2215_v33 }
0x10a6   : > { %v2217_v34 = vmul.f32 0.5, %v2216_v41  ;;  %v2817_v41 = vld [vmem:[%s3438_s10] ss:$0 sm:$0xff] }
0x10a8   : > { %v2218_v32 = vsub.f32 1.5, %v2217_v34 }
0x10aa   : > { %v2219_v35 = vmul.f32 %v2844_v31, %v2218_v32 }
0x10ac   : > { %v2223_v0 = vsel %vm2222_vm3, %v2844_v31, %v2219_v35 }
0x10ad   : > { %v2224_v37 = vmul.f32 %v2223_v0, %v2207_v49 }
0x10af   : > { %v2228_v39 = vmul.f32 %v2814_v36, %v2224_v37 }
0x10b1   : > { %v3290_v40 = vadd.f32 %v2815_v38, %v2228_v39 }
0x10b3   : > { %2741 = vmatmul.msk.f32.vlgmr.msrb.gmra.mxu3 %vm553_vm0, %v3290_v40 }
0x1136   : > { %v2261_v43 = vpop.f32.mrf.mxu3 }
0x1137   : > { %v2262_v45 = vadd.f32 %v2816_v42, %v2261_v43 }
0x1139   : > { %v2265_v46 = vmul.f32 0.70710677, %v2262_v45  ;;  %v2264_v30 = vmul.f32 0.5, %v2262_v45 }
0x113b   : > { %v2266_v51 = vmul.f32 %v2265_v46, %v2265_v46 }
0x113d   : > { %v2267_v54 = vmin.f32 %v2266_v51, 16.0 }
0x113f   : > { %v2268_v58 = vmul.f32 2.1237322e-06, %v2267_v54  ;;  %v2279_v59 = vmul.f32 3.8918573e-05, %v2267_v54 }
0x1141   : > { %v2269_v60 = vadd.f32 0.00028619796, %v2268_v58  ;;  %v2280_v62 = vadd.f32 0.001143296, %v2279_v59 }
0x1143   : > { %v2270_v63 = vmul.f32 %v2269_v60, %v2267_v54  ;;  %v2281_v1 = vmul.f32 %v2280_v62, %v2267_v54 }
0x1145   : > { %v2282_v7 = vadd.f32 0.014752088, %v2281_v1  ;;  %v2271_v5 = vadd.f32 0.0036580483, %v2270_v63 }
0x1147   : > { %v2283_v6 = vmul.f32 %v2282_v7, %v2267_v54  ;;  %v2272_v12 = vmul.f32 %v2271_v5, %v2267_v54  ;;  %v2406_v7 = vld [vmem:[%s3441_s13 + $0x58] sm:$0xff]  ;;  %v2404_v5 = vld [vmem:[%s3441_s13 + $0x48] sm:$0xff] }
0x1148   : > { %2419 = vmatpush.msra.mxu1 %v2406_v7 }
0x1149   : > { %v2284_v10 = vadd.f32 0.112945676, %v2283_v6  ;;  %v2273_v15 = vadd.f32 0.05243302, %v2272_v12  ;;  %v2403_v6 = vld [vmem:[%s3441_s13 + $0x40] sm:$0xff] }
0x114a   : > { %2420 = vmatpush.msra.mxu1 %v2405_v3  ;;  %v2399_v12 = vld [vmem:[%s3441_s13 + $0x20] sm:$0xff] }
0x114b   : > { %v2285_v13 = vmul.f32 %v2284_v10, %v2267_v54  ;;  %v2274_v17 = vmul.f32 %v2273_v15, %v2267_v54  ;;  %v2401_v10 = vld [vmem:[%s3441_s13 + $0x30] sm:$0xff]  ;;  %v2395_v15 = vld [vmem:[%s3441_s13] sm:$0xff] }
0x114c   : > { %2421 = vmatpush.msra.mxu1 %v2404_v5 }
0x114d   : > { %v2286_v14 = vadd.f32 0.4994258, %v2285_v13  ;;  %v2275_v18 = vadd.f32 0.18741608, %v2274_v17  ;;  %v2397_v13 = vld [vmem:[%s3441_s13 + $0x10] sm:$0xff] }
0x114e   : > { %2422 = vmatpush.msra.mxu1 %v2403_v6 }
0x114f   : > { %v2287_v52 = vmul.f32 %v2286_v14, %v2267_v54  ;;  %v2276_v19 = vmul.f32 %v2275_v18, %v2267_v54  ;;  %v2396_v14 = vld [vmem:[%s3441_s13 + $0x8] sm:$0xff] }
0x1150   : > { %2423 = vmatpush.msra.mxu1 %v2402_v9 }
0x1151   : > { %v2288_v16 = vadd.f32 1.0, %v2287_v52  ;;  %v2277_v55 = vadd.f32 1.1283791, %v2276_v19  ;;  %v2444_v19 = vmul.u32 2, %v3117_v47 }
0x1152   : > { %2424 = vmatpush.msra.mxu1 %v2401_v10 }
0x1153   : > { %2845 = vrcp.f32 %v2288_v16  ;;  %v2300_v23 = vand.u32 2147483648, %v2288_v16  ;;  %v2298_v56 = vand.u32 2147483647, %v2288_v16  ;;  %vm2294_vm5 = vweird.f32 %v2288_v16 }
0x1154   : > { %v2278_v25 = vmul.f32 %v2277_v55, %v2265_v46  ;;  %2425 = vmatpush.msra.mxu1 %v2400_v11  ;;  %vm2445_vm13 = vcmp.eq.s32.totalorder %v3119_v48, %v2444_v19  ;;  %v2821_v11 = vld [vmem:[%s3443_s15] ss:$0 sm:$0xff] }
0x1155   : > { %v2301_v24 = vor.u32 1.1754944e-38, %v2300_v23  ;;  %vm2299_vm7 = vcmp.eq.f32.partialorder %v2298_v56, 8.507059e+37  ;;  %v2820_v23 = vld [vmem:[%s3442_s14] ss:$0 sm:$0xff] }
0x1156   : > { %2426 = vmatpush.msra.mxu1 %v2399_v12 }
0x1158   : > { %2427 = vmatpush.msra.mxu1 %v2398_v53  ;;  %v2822_v53 = vld [vmem:[%s3444_s16] ss:$0 sm:$0xff] }
0x1159   : > { %v2846_v44 = vpop.eup %2845 }
0x115a   : > { %v2290_v20 = vmul.f32 %v2846_v44, %v2288_v16  ;;  %vm2295_vm4 = vweird.f32 %v2846_v44  ;;  %2428 = vmatpush.msra.mxu1 %v2397_v13 }
0x115b   : > { %vm2296_vm6 = vmor %vm2294_vm5, %vm2295_vm4 }
0x115c   : > { %v2291_v21 = vsub.f32 1.0, %v2290_v20  ;;  %2429 = vmatpush.msra.mxu1 %v2396_v14  ;;  %v2745_v20 = vsel %vm2445_vm13, 1.0, %v2920_v50 }
0x115e   : > { %v2292_v49 = vmul.f32 %v2846_v44, %v2291_v21  ;;  %2430 = vmatpush.msra.mxu1 %v2395_v15  ;;  %v2449_v21 = vsel %vm588_vm1, %v2745_v20, 0 }
0x115f   : > { %v2469_v55 = vsub.f32 %v2449_v21, %v2449_v21 }
0x1160   : > { %v2293_v4 = vadd.f32 %v2846_v44, %v2292_v49 }
0x1162   : > { %v2297_v26 = vsel %vm2296_vm6, %v2846_v44, %v2293_v4  ;;  %v2470_v4 = vand.u32 4294901760, %v2469_v55 }
0x1163   : > { %v2302_v27 = vsel %vm2299_vm7, %v2301_v24, %v2297_v26 }
0x1164   : > { %v2303_v28 = vmul.f32 %v2302_v27, %v2278_v25  ;;  %v2471_v47 = vsub.f32 %v2469_v55, %v2470_v4 }
0x1166   : > { %v2742_v29 = vclamps-f32 %v2303_v28, 1.0  ;;  %v2472_v50 = vand.u32 4294901760, %v2471_v47 }
0x1168   : > { %v2306_v31 = vadd.f32 1.0, %v2742_v29 }
0x116a   : > { %v2307_v33 = vmul.f32 %v2306_v31, %v2264_v30 }
0x116c   : > { %2743 = vmatmul.msk.f32.vlgmr.msrb.gmra.mxu0 %vm2320_vm8, %v2307_v33 }
0x11e9   : > { %v2341_v34 = vpop.f32.mrf.mxu0 }
0x11ea   : > { %v2342_v32 = vadd.f32 %v2817_v41, %v2341_v34 }
0x11ec   : > { %v2344_v35 = vadd.f32 %v2342_v32, %v3290_v40 }
0x11ee   : > { %v2347_v36 = vsel %vm553_vm0, %v2344_v35, 0.0 }
0x11ef   : > { %2348 = vadd.xlane.f32.xlu1 %v2347_v36 }
0x1262   : > { %v2349_v0 = vpop.xlane.xlu1 %2348 }
0x1263   : > { %v2350_v37 = vmul.f32 %v2349_v0, %v3267_v22 }
0x1265   : > { %v2351_v38 = vsub.f32 %v2344_v35, %v2350_v37 }
0x1267   : > { %v2352_v39 = vmul.f32 %v2351_v38, %v2351_v38 }
0x1269   : > { %v2353_v42 = vsel %vm553_vm0, %v2352_v39, 0.0 }
0x126a   : > { %2354 = vadd.xlane.f32.xlu1 %v2353_v42 }
0x12dd   : > { %v2355_v43 = vpop.xlane.xlu1 %2354 }
0x12de   : > { %v2356_v45 = vmul.f32 %v2355_v43, %v3267_v22 }
0x12e0   : > { %v2357_v46 = vadd.f32 1e-05, %v2356_v45 }
0x12e2   : > { %2847 = vrsqrt.f32 %v2357_v46  ;;  %vm2364_vm10 = vweird.f32 %v2357_v46 }
0x12e8   : > { %v2848_v51 = vpop.eup %2847 }
0x12e9   : > { %v2359_v54 = vmul.f32 %v2848_v51, %v2357_v46  ;;  %vm2365_vm9 = vweird.f32 %v2848_v51 }
0x12ea   : > { %vm2366_vm11 = vmor %vm2364_vm10, %vm2365_vm9 }
0x12eb   : > { %v2360_v57 = vmul.f32 %v2848_v51, %v2359_v54 }
0x12ed   : > { %v2361_v40 = vmul.f32 0.5, %v2360_v57 }
0x12ef   : > { %v2362_v58 = vsub.f32 1.5, %v2361_v40 }
0x12f1   : > { %v2363_v59 = vmul.f32 %v2848_v51, %v2362_v58 }
0x12f3   : > { %v2367_v60 = vsel %vm2366_vm11, %v2848_v51, %v2363_v59 }
0x12f4   : > { %v2368_v62 = vmul.f32 %v2367_v60, %v2351_v38 }
0x12f6   : > { %v2372_v63 = vmul.f32 %v2818_v8, %v2368_v62 }
0x12f8   : > { %v2376_v1 = vadd.f32 %v2819_v61, %v2372_v63 }
0x12fa   : > { %2386 = vrot.lane.b32.xlu1 %v2376_v1, %s2935_s30  ;;  %v2382_v2 = vrot.slane %v2376_v1, 1  ;;  %v2378_v52 = vrot.slane %v2376_v1, 7 }
0x12fc   : > { %2390 = vrot.lane.b32.xlu2 %v2382_v2, %s2923_s27  ;;  %s2867_s27 = sshra.s32 %s2653_s2, 4  ;;  %s2868_s27 = int_to_ptr.hbm [resolvable:$true] %s2867_s27 }
0x12fd   : > { %s2869_s22 = scalar_lea.hbm %s2868_s27, 4  ;;  %p2874_p0 = scmp.lt.s32.totalorder %s2868_s27, %s3445_s17 }
0x12fe   : > { %p2870_p11 = scmp.ne.s32.totalorder %s2868_s27, %s2869_s22  ;;  %p2875_p1 = scmp.lt.s32.totalorder %s2873_s21, %s2869_s22 }
0x1300   : > { %p2871_p12 = pnand %p2870_p11, %p3064_p5  ;;  %p2876_p2 = por %p2875_p1, %p2874_p0 }
0x1302   : > { %p2872_p13 = pneg %p2871_p12 }
0x1304   : > { %p2877_p3 = pnand %p2876_p2, %p2872_p13 }
0x1356   : > { %v2391_v17 = vpop.permute.xlu2 %2390 }
0x136c   : > { %v2387_v16 = vpop.permute.xlu1 %2386 }
0x136d   : > { %v2393_v18 = vsel %vm553_vm0, %v2378_v52, %v2387_v16  ;;  %vm2380_vm0 = vcmask 1040384  }
0x136e   : > { %v2394_v44 = vsel %vm2320_vm8, %v2393_v18, %v2391_v17 }
0x136f   : > { %2744 = vmatmul.msk.f32.vlgmr.msra.gmra.mxu1 %vm2411_vm12, %v2394_v44 }
0x13ec   : > { %v2432_v49 = vpop.f32.mrf.mxu1 }
0x13ed   : > { %v2433_v56 = vadd.f32 %v2820_v23, %v2432_v49 }
0x13ef   : > { %v2436_v24 = vrot.slane %v2433_v56, 7  ;;  %v2439_v25 = vrot.slane %v2433_v56, 1 }
0x13f1   : > { %v2438_v26 = vsel %vm2380_vm0, -1e+30, %v2436_v24  ;;  %v2441_v48 = vsel %vm2384_vm14, %v2439_v25, -1e+30 }
0x13f2   : > { %v2442_v27 = vmax.f32 %v2438_v26, %v2433_v56 }
0x13f4   : > { %v2443_v28 = vmax.f32 %v2442_v27, %v2441_v48 }
0x13f6   : > { %v2466_v29 = vand.u32 4294901760, %v2443_v28 }
0x13f8   : > { %2467 = vmatpush.msra.mxu2 %v2466_v29  ;;  %v2493_v30 = vsub.f32 %v2443_v28, %v2466_v29 }
0x13f9   : > { %2473 = vmatmul.f32.vlgmr.msra.gmra.mxu2 %v2472_v50 }
0x13fa   : > { %2520 = vmatpush.msrb.mxu2 %v2493_v30  ;;  %v2494_v31 = vand.u32 4294901760, %v2493_v30 }
0x13fc   : > { %2591 = vmatpush.msra.mxu2 %v2466_v29  ;;  %2569 = vmatpush.msra.mxu0 %v2494_v31  ;;  %v2495_v33 = vsub.f32 %v2493_v30, %v2494_v31 }
0x13fd   : > { %2747 = vmatmul.msk.f32.vlgmr.msra.gmra.mxu0 %vm588_vm1, %v2745_v20 }
0x13fe   : > { %v2496_v41 = vand.u32 4294901760, %v2495_v33 }
0x1400   : > { %2497 = vmatpush.msra.mxu3 %v2496_v41 }
0x1401   : > { %2746 = vmatmul.msk.f32.vlgmr.msra.gmra.mxu3 %vm588_vm1, %v2745_v20  ;;  %2523 = vmatmul.f32.vlgmr.msrb.gmra.mxu2 %v2469_v55 }
0x1402   : > { %2543 = vmatpush.msrb.mxu3 %v2466_v29 }
0x1409   : > { %2547 = vmatmul.f32.vlgmr.msrb.gmra.mxu3 %v2470_v4  ;;  %2748 = vmatmul.msk.f32.vlgmr.msra.gmra.mxu2 %vm588_vm1, %v2745_v20 }
0x147a   : > { %v2572_v38 = vpop.f32.mrf.mxu0 }
0x147c   : > { %v2474_v34 = vpop.f32.mrf.mxu2 }
0x1484   : > { %v2500_v32 = vpop.f32.mrf.mxu3  ;;  %v2524_v35 = vpop.f32.mrf.mxu2 }
0x1485   : > { %v2501_v36 = vadd.f32 %v2500_v32, %v2474_v34 }
0x1487   : > { %v2525_v0 = vadd.f32 %v2524_v35, %v2501_v36 }
0x148c   : > { %v2548_v37 = vpop.f32.mrf.mxu3  ;;  %v2594_v42 = vpop.f32.mrf.mxu2 }
0x148d   : > { %v2549_v39 = vadd.f32 %v2548_v37, %v2525_v0 }
0x148f   : > { %v2573_v43 = vadd.f32 %v2572_v38, %v2549_v39 }
0x1491   : > { %v2595_v45 = vadd.f32 %v2594_v42, %v2573_v43 }
0x1493   : > { %v2598_v46 = vmin.f32 %v2595_v45, 0.0  ;;  %vm2597_vm2 = vcmp.gt.f32.partialorder %v2595_v45, 0.0 }
0x1495   : > { %v2599_v51 = vmul.f32 1.442695, %v2598_v46 }
0x1497   : > { %2849 = vpow2.f32 %v2599_v51 }
0x149d   : > { %v2850_v54 = vpop.eup %2849 }
0x149e   : > { %v2749_v57 = vadd.f32 -1.0, %v2850_v54 }
0x14a0   : > { %v2602_v40 = vsel %vm2597_vm2, %v2595_v45, %v2749_v57 }
0x14a1   : > { %v2606_v58 = vsel %vm2605_vm15, %v2602_v40, 0.0 }
0x14a2   : > { %2607 = vadd.xlane.f32.xlu1 %v2606_v58 }
0x1515   : > { %v2608_v59 = vpop.xlane.xlu1 %2607 }
0x1516   : > { %v2609_v8 = vmul.f32 %v2608_v59, %v3267_v22 }
0x1518   : > { %v2610_v60 = vsub.f32 %v2602_v40, %v2609_v8 }
0x151a   : > { %v2611_v62 = vmul.f32 %v2610_v60, %v2610_v60 }
0x151c   : > { %v2612_v61 = vsel %vm2605_vm15, %v2611_v62, 0.0 }
0x151d   : > { %2613 = vadd.xlane.f32.xlu2 %v2612_v61 }
0x1590   : > { %v2614_v63 = vpop.xlane.xlu2 %2613 }
0x1591   : > { %v2615_v1 = vmul.f32 %v2614_v63, %v3267_v22 }
0x1593   : > { %v2616_v2 = vadd.f32 1e-05, %v2615_v1 }
0x1595   : > { %2851 = vrsqrt.f32 %v2616_v2  ;;  %vm2623_vm3 = vweird.f32 %v2616_v2 }
0x159b   : > { %v2852_v7 = vpop.eup %2851 }
0x159c   : > { %v2618_v3 = vmul.f32 %v2852_v7, %v2616_v2  ;;  %vm2624_vm1 = vweird.f32 %v2852_v7 }
0x159d   : > { %vm2625_vm4 = vmor %vm2623_vm3, %vm2624_vm1 }
0x159e   : > { %v2619_v5 = vmul.f32 %v2852_v7, %v2618_v3 }
0x15a0   : > { %v2620_v6 = vmul.f32 0.5, %v2619_v5 }
0x15a2   : > { %v2621_v9 = vsub.f32 1.5, %v2620_v6 }
0x15a4   : > { %v2622_v10 = vmul.f32 %v2852_v7, %v2621_v9 }
0x15a6   : > { %v2626_v22 = vsel %vm2625_vm4, %v2852_v7, %v2622_v10 }
0x15a7   : > { %v2627_v12 = vmul.f32 %v2626_v22, %v2610_v60 }
0x15a9   : > { %v2631_v13 = vmul.f32 %v2821_v11, %v2627_v12 }
0x15ab   : > { %v2635_v14 = vadd.f32 %v2822_v53, %v2631_v13 }
0x15ad   : > { %2636 = vst.msk [vmem:[%s539_s20] sm:$0xf] %vm2605_vm15, %v2635_v14 }
0x15ae   : > { %2880 = shalt.err (!%p2877_p3)
}
0x15af   : > { %2754 = dma.vmem_to_hbm [thread:$0]  (%p3064_p5), %s2651_s28, 64, %s2653_s2, %s2638_s29  }
0x15b0 PF: > { %s3471_s18 = sld [smem:[#allocation7_spill]] }
0x15b1   : > { %s3472_s26 = sld [smem:[#allocation5_spill]] }
0x15b6   : > { %p2760_p4 = scmp.ge.s32.totalorder %s3471_s18, 2 }
0x15b7   : > { %s2664_s3 = sand.u32 1, %s3472_s26  }
0x15b8   : > { %p2757_p7 = pnand %p2760_p4, %p3068_p6  ;;  %s2665_s19 = scalar_lea.sflag [#allocation3], %s2664_s3 }
0x15ba   : > { %p2758_p8 = pneg %p2757_p7 }
0x15bc   : > { %2898 = dma.done.wait (%p2758_p8), %s2665_s19, 64  }
0x15bd   : > { %2900 = vsyncadd (%p2758_p8), %s2665_s19, 4294967232  ;;  %s3474_s27 = sld [smem:[#allocation8_spill]]  ;;  %s3477_s24 = smov %s2907_s25 }
0x15be   : > { %s3475_s22 = sld [smem:[#allocation6_spill]] }
0x15bf   : > { %s3476_s26 = sld [smem:[#allocation9_spill]] }
0x15c3   : > { %p27_p9 = scmp.ge.s32.totalorder %s3474_s27, 4  }
0x15c4   : > { %s3478_s25 = smov %s3475_s22 }
0x15c5   :  { %29 = sbr.rel (!%p27_p9) target bundleno = 8 (0x8), region = 123 }
0x15ca   :  { %2671 = vsyncpa [#allocation3], 1 }
0x15cb   :  { %2673 = vsyncpa [#allocation3 + $0x1], 1 }

</bundles_post_ra>
